<compile_context>
chip_gen: v7x
topology: tpu7x:2x2x1
jax: 0.10.0
libtpu: 0.0.40
codegen_flags: <defaults>
</compile_context>

<pallas_src>
import jax
import jax.numpy as jnp
from jax.experimental import pallas as pl
from jax.experimental.pallas import tpu as pltpu


def lstm_fc_kernel(xf_ref, w_ih_ref, w_hh_ref, b_ref, w_fc_ref, b_fc_ref,
                   out_ref, g_scr):
    """Whole forward in one kernel invocation (no grid)."""
    Bp, _ = out_ref.shape
    Hp = w_hh_ref.shape[0]
    T = xf_ref.shape[0] // Bp

    # ---- Phase 1: input projection for all timesteps, one big MXU matmul ----
    g_scr[...] = (
        jnp.dot(xf_ref[...], w_ih_ref[...], preferred_element_type=jnp.float32)
        + b_ref[...])                                    # (T*Bp, 4*Hp)

    # ---- Phase 2: serial recurrence; h/c are loop carries (stay in vregs) ----
    def step(t, carry):
        h, c = carry
        row = pl.multiple_of(t * Bp, Bp)
        gates = (g_scr[pl.ds(row, Bp), :]
                 + jnp.dot(h, w_hh_ref[...],
                           preferred_element_type=jnp.float32))   # (Bp, 4*Hp)
        # PyTorch gate order i, f, g, o; Hp % 128 == 0 so slices are lane-aligned.
        i_g = jax.nn.sigmoid(gates[:, 0 * Hp:1 * Hp])
        f_g = jax.nn.sigmoid(gates[:, 1 * Hp:2 * Hp])
        g_g = jnp.tanh(gates[:, 2 * Hp:3 * Hp])
        o_g = jax.nn.sigmoid(gates[:, 3 * Hp:4 * Hp])
        c_new = f_g * c + i_g * g_g
        h_new = o_g * jnp.tanh(c_new)
        return h_new, c_new

    h0 = jnp.zeros((Bp, Hp), jnp.float32)
    c0 = jnp.zeros((Bp, Hp), jnp.float32)
    h_T, _ = jax.lax.fori_loop(0, T, step, (h0, c0), unroll=True)

    # ---- Phase 3: final Linear on last hidden state (lane-dense store) ----
    out_ref[...] = (
        jnp.dot(h_T, w_fc_ref[...], preferred_element_type=jnp.float32)
        + b_fc_ref[...]).astype(out_ref.dtype)


def _round_up(n, m):
    return ((n + m - 1) // m) * m


def rnn_forward(x, w_ih, w_hh, b, w_fc, b_fc):
    """x: (B, T, I) batch-first (like the PyTorch module).
    Weights pre-transposed: w_ih (I, 4H), w_hh (H, 4H), b (1, 4H)=b_ih+b_hh,
    w_fc (H, O), b_fc (1, O).  Returns (B, O)."""
    B, T, I = x.shape
    H = w_hh.shape[0]
    O = w_fc.shape[1]

    LANE, SUBLANE = 128, 8
    Hp = _round_up(H, LANE)
    Op = _round_up(O, LANE)
    Bp = _round_up(B, SUBLANE)

    # Gate-wise zero padding keeps (i,f,g,o) blocks 128-lane aligned and makes
    # padded hidden/cell columns stay exactly zero through the recurrence.
    w_ih_p = jnp.pad(w_ih.reshape(I, 4, H),
                     ((0, 0), (0, 0), (0, Hp - H))).reshape(I, 4 * Hp)
    w_hh_p = jnp.pad(w_hh.reshape(H, 4, H),
                     ((0, Hp - H), (0, 0), (0, Hp - H))).reshape(Hp, 4 * Hp)
    b_p = jnp.pad(b.reshape(1, 4, H),
                  ((0, 0), (0, 0), (0, Hp - H))).reshape(1, 4 * Hp)
    w_fc_p = jnp.pad(w_fc, ((0, Hp - H), (0, Op - O)))
    b_fc_p = jnp.pad(b_fc, ((0, 0), (0, Op - O)))

    # Time-major, batch padded to a sublane multiple, flattened so the kernel
    # can do the input projection for all T steps as a single 2-D matmul.
    xf = jnp.transpose(x, (1, 0, 2))                      # (T, B, I)
    xf = jnp.pad(xf, ((0, 0), (0, Bp - B), (0, 0)))       # (T, Bp, I)
    xf = xf.reshape(T * Bp, I)

    out_p = pl.pallas_call(
        lstm_fc_kernel,
        out_shape=jax.ShapeDtypeStruct((Bp, Op), jnp.float32),
        in_specs=[pl.BlockSpec(memory_space=pltpu.MemorySpace.VMEM)] * 6,
        out_specs=pl.BlockSpec(memory_space=pltpu.MemorySpace.VMEM),
        scratch_shapes=[pltpu.VMEM((T * Bp, 4 * Hp), jnp.float32)],
    )(xf, w_ih_p, w_hh_p, b_p, w_fc_p, b_fc_p)

    return out_p[:B, :O]


def reference_forward(x, w_ih, w_hh, b, w_fc, b_fc):
    """Pure-JAX reference matching PyTorch LSTM semantics."""
    B, T, I = x.shape
    H = w_hh.shape[0]
    h = jnp.zeros((B, H), jnp.float32)
    c = jnp.zeros((B, H), jnp.float32)
    for t in range(T):
        gates = x[:, t, :] @ w_ih + h @ w_hh + b
        i_g = jax.nn.sigmoid(gates[:, 0 * H:1 * H])
        f_g = jax.nn.sigmoid(gates[:, 1 * H:2 * H])
        g_g = jnp.tanh(gates[:, 2 * H:3 * H])
        o_g = jax.nn.sigmoid(gates[:, 3 * H:4 * H])
        c = f_g * c + i_g * g_g
        h = o_g * jnp.tanh(c)
    return h @ w_fc + b_fc


if __name__ == "__main__":
    # Small shapes implied by the forward: x is (batch, seq, input_size)
    B, T, I, H, O = 2, 8, 16, 32, 8

    key = jax.random.PRNGKey(0)
    k_x, k_wih, k_whh, k_bih, k_bhh, k_wfc, k_bfc = jax.random.split(key, 7)

    # PyTorch-style uniform(-1/sqrt(H), 1/sqrt(H)) init, deterministic from key.
    bound = 1.0 / jnp.sqrt(jnp.float32(H))
    w_ih = jax.random.uniform(k_wih, (I, 4 * H), jnp.float32, -bound, bound)
    w_hh = jax.random.uniform(k_whh, (H, 4 * H), jnp.float32, -bound, bound)
    b_ih = jax.random.uniform(k_bih, (1, 4 * H), jnp.float32, -bound, bound)
    b_hh = jax.random.uniform(k_bhh, (1, 4 * H), jnp.float32, -bound, bound)
    b = b_ih + b_hh
    w_fc = jax.random.uniform(k_wfc, (H, O), jnp.float32, -bound, bound)
    b_fc = jax.random.uniform(k_bfc, (1, O), jnp.float32, -bound, bound)

    x = jax.random.normal(k_x, (B, T, I), jnp.float32)

    out = rnn_forward(x, w_ih, w_hh, b, w_fc, b_fc)
    out = jax.block_until_ready(out)

    ref = reference_forward(x, w_ih, w_hh, b, w_fc, b_fc)
    assert out.shape == (B, O)
    assert jnp.allclose(out, ref, atol=1e-4, rtol=1e-4), "mismatch vs reference"

    print("KERNEL_OK")
</pallas_src>

<mosaic_0001>
module attributes {stable_mosaic.version = 11 : i64} {
  func.func @lstm_fc_kernel(%arg0: memref<64x16xf32, #tpu.memory_space<vmem>>, %arg1: memref<16x512xf32, #tpu.memory_space<vmem>>, %arg2: memref<128x512xf32, #tpu.memory_space<vmem>>, %arg3: memref<1x512xf32, #tpu.memory_space<vmem>>, %arg4: memref<128x128xf32, #tpu.memory_space<vmem>>, %arg5: memref<1x128xf32, #tpu.memory_space<vmem>>, %arg6: memref<8x128xf32, #tpu.memory_space<vmem>>, %arg7: memref<64x512xf32, #tpu.memory_space<vmem>>) attributes {dimension_semantics = [], scalar_prefetch = 0 : i64, scratch_operands = 1 : i64, tpu.core_type = #tpu.core_type<tc>} {
    %c0 = arith.constant 0 : index
    %c0_0 = arith.constant 0 : index
    %0 = vector.load %arg0[%c0, %c0_0] : memref<64x16xf32, #tpu.memory_space<vmem>>, vector<64x16xf32>
    %c0_1 = arith.constant 0 : index
    %c0_2 = arith.constant 0 : index
    %1 = vector.load %arg1[%c0_1, %c0_2] : memref<16x512xf32, #tpu.memory_space<vmem>>, vector<16x512xf32>
    %cst = arith.constant dense<0.000000e+00> : vector<64x512xf32>
    %2 = tpu.matmul %0, %1, %cst {dimension_numbers = #tpu.dot_dimension_numbers<[1], [0], [0], [1], [0, 0, 1, 1], [], []>} : vector<64x16xf32>, vector<16x512xf32>, vector<64x512xf32> -> vector<64x512xf32>
    %c0_3 = arith.constant 0 : index
    %c0_4 = arith.constant 0 : index
    %3 = vector.load %arg3[%c0_3, %c0_4] : memref<1x512xf32, #tpu.memory_space<vmem>>, vector<1x512xf32>
    %4 = vector.broadcast %3 : vector<1x512xf32> to vector<64x512xf32>
    %5 = arith.addf %2, %4 : vector<64x512xf32>
    %c0_5 = arith.constant 0 : index
    %c0_6 = arith.constant 0 : index
    %6 = vector.load %arg7[%c0_5, %c0_6] : memref<64x512xf32, #tpu.memory_space<vmem>>, vector<64x512xf32>
    tpu.vector_store %arg7[%c0_5, %c0_6], %5 {strides = array<i32>} : memref<64x512xf32, #tpu.memory_space<vmem>>, vector<64x512xf32>,
    %cst_7 = arith.constant 0.000000e+00 : f32
    %7 = vector.broadcast %cst_7 : f32 to vector<8x128xf32>
    %cst_8 = arith.constant 0.000000e+00 : f32
    %8 = vector.broadcast %cst_8 : f32 to vector<8x128xf32>
    %c0_i32 = arith.constant 0 : i32
    %c8_i32 = arith.constant 8 : i32
    %9 = arith.muli %c0_i32, %c8_i32 : i32
    %10 = tpu.assume_multiple %9, 8 : i32
    %11 = arith.index_cast %10 : i32 to index
    %c0_9 = arith.constant 0 : index
    %12 = vector.load %arg7[%11, %c0_9] : memref<64x512xf32, #tpu.memory_space<vmem>>, vector<8x512xf32>
    %c0_10 = arith.constant 0 : index
    %c0_11 = arith.constant 0 : index
    %13 = vector.load %arg2[%c0_10, %c0_11] : memref<128x512xf32, #tpu.memory_space<vmem>>, vector<128x512xf32>
    %cst_12 = arith.constant dense<0.000000e+00> : vector<8x512xf32>
    %14 = tpu.matmul %7, %13, %cst_12 {dimension_numbers = #tpu.dot_dimension_numbers<[1], [0], [0], [1], [0, 0, 1, 1], [], []>} : vector<8x128xf32>, vector<128x512xf32>, vector<8x512xf32> -> vector<8x512xf32>
    %15 = arith.addf %12, %14 : vector<8x512xf32>
    %16 = vector.extract_strided_slice %15 {offsets = [0, 0], sizes = [8, 128], strides = [1, 1]} : vector<8x512xf32> to vector<8x128xf32>
    %17 = arith.negf %16 : vector<8x128xf32>
    %18 = math.exp %17 : vector<8x128xf32>
    %cst_13 = arith.constant 1.000000e+00 : f32
    %19 = vector.broadcast %cst_13 : f32 to vector<8x128xf32>
    %20 = arith.addf %19, %18 : vector<8x128xf32>
    %21 = arith.divf %19, %20 : vector<8x128xf32>
    %22 = vector.extract_strided_slice %15 {offsets = [0, 128], sizes = [8, 128], strides = [1, 1]} : vector<8x512xf32> to vector<8x128xf32>
    %23 = arith.negf %22 : vector<8x128xf32>
    %24 = math.exp %23 : vector<8x128xf32>
    %cst_14 = arith.constant 1.000000e+00 : f32
    %25 = vector.broadcast %cst_14 : f32 to vector<8x128xf32>
    %26 = arith.addf %25, %24 : vector<8x128xf32>
    %27 = arith.divf %25, %26 : vector<8x128xf32>
    %28 = vector.extract_strided_slice %15 {offsets = [0, 256], sizes = [8, 128], strides = [1, 1]} : vector<8x512xf32> to vector<8x128xf32>
    %29 = math.tanh %28 : vector<8x128xf32>
    %30 = vector.extract_strided_slice %15 {offsets = [0, 384], sizes = [8, 128], strides = [1, 1]} : vector<8x512xf32> to vector<8x128xf32>
    %31 = arith.negf %30 : vector<8x128xf32>
    %32 = math.exp %31 : vector<8x128xf32>
    %cst_15 = arith.constant 1.000000e+00 : f32
    %33 = vector.broadcast %cst_15 : f32 to vector<8x128xf32>
    %34 = arith.addf %33, %32 : vector<8x128xf32>
    %35 = arith.divf %33, %34 : vector<8x128xf32>
    %36 = arith.mulf %27, %8 : vector<8x128xf32>
    %37 = arith.mulf %21, %29 : vector<8x128xf32>
    %38 = arith.addf %36, %37 : vector<8x128xf32>
    %39 = math.tanh %38 : vector<8x128xf32>
    %40 = arith.mulf %35, %39 : vector<8x128xf32>
    %c1_i32 = arith.constant 1 : i32
    %c8_i32_16 = arith.constant 8 : i32
    %41 = arith.muli %c1_i32, %c8_i32_16 : i32
    %42 = tpu.assume_multiple %41, 8 : i32
    %43 = arith.index_cast %42 : i32 to index
    %c0_17 = arith.constant 0 : index
    %44 = vector.load %arg7[%43, %c0_17] : memref<64x512xf32, #tpu.memory_space<vmem>>, vector<8x512xf32>
    %c0_18 = arith.constant 0 : index
    %c0_19 = arith.constant 0 : index
    %45 = vector.load %arg2[%c0_18, %c0_19] : memref<128x512xf32, #tpu.memory_space<vmem>>, vector<128x512xf32>
    %cst_20 = arith.constant dense<0.000000e+00> : vector<8x512xf32>
    %46 = tpu.matmul %40, %45, %cst_20 {dimension_numbers = #tpu.dot_dimension_numbers<[1], [0], [0], [1], [0, 0, 1, 1], [], []>} : vector<8x128xf32>, vector<128x512xf32>, vector<8x512xf32> -> vector<8x512xf32>
    %47 = arith.addf %44, %46 : vector<8x512xf32>
    %48 = vector.extract_strided_slice %47 {offsets = [0, 0], sizes = [8, 128], strides = [1, 1]} : vector<8x512xf32> to vector<8x128xf32>
    %49 = arith.negf %48 : vector<8x128xf32>
    %50 = math.exp %49 : vector<8x128xf32>
    %cst_21 = arith.constant 1.000000e+00 : f32
    %51 = vector.broadcast %cst_21 : f32 to vector<8x128xf32>
    %52 = arith.addf %51, %50 : vector<8x128xf32>
    %53 = arith.divf %51, %52 : vector<8x128xf32>
    %54 = vector.extract_strided_slice %47 {offsets = [0, 128], sizes = [8, 128], strides = [1, 1]} : vector<8x512xf32> to vector<8x128xf32>
    %55 = arith.negf %54 : vector<8x128xf32>
    %56 = math.exp %55 : vector<8x128xf32>
    %cst_22 = arith.constant 1.000000e+00 : f32
    %57 = vector.broadcast %cst_22 : f32 to vector<8x128xf32>
    %58 = arith.addf %57, %56 : vector<8x128xf32>
    %59 = arith.divf %57, %58 : vector<8x128xf32>
    %60 = vector.extract_strided_slice %47 {offsets = [0, 256], sizes = [8, 128], strides = [1, 1]} : vector<8x512xf32> to vector<8x128xf32>
    %61 = math.tanh %60 : vector<8x128xf32>
    %62 = vector.extract_strided_slice %47 {offsets = [0, 384], sizes = [8, 128], strides = [1, 1]} : vector<8x512xf32> to vector<8x128xf32>
    %63 = arith.negf %62 : vector<8x128xf32>
    %64 = math.exp %63 : vector<8x128xf32>
    %cst_23 = arith.constant 1.000000e+00 : f32
    %65 = vector.broadcast %cst_23 : f32 to vector<8x128xf32>
    %66 = arith.addf %65, %64 : vector<8x128xf32>
    %67 = arith.divf %65, %66 : vector<8x128xf32>
    %68 = arith.mulf %59, %38 : vector<8x128xf32>
    %69 = arith.mulf %53, %61 : vector<8x128xf32>
    %70 = arith.addf %68, %69 : vector<8x128xf32>
    %71 = math.tanh %70 : vector<8x128xf32>
    %72 = arith.mulf %67, %71 : vector<8x128xf32>
    %c2_i32 = arith.constant 2 : i32
    %c8_i32_24 = arith.constant 8 : i32
    %73 = arith.muli %c2_i32, %c8_i32_24 : i32
    %74 = tpu.assume_multiple %73, 8 : i32
    %75 = arith.index_cast %74 : i32 to index
    %c0_25 = arith.constant 0 : index
    %76 = vector.load %arg7[%75, %c0_25] : memref<64x512xf32, #tpu.memory_space<vmem>>, vector<8x512xf32>
    %c0_26 = arith.constant 0 : index
    %c0_27 = arith.constant 0 : index
    %77 = vector.load %arg2[%c0_26, %c0_27] : memref<128x512xf32, #tpu.memory_space<vmem>>, vector<128x512xf32>
    %cst_28 = arith.constant dense<0.000000e+00> : vector<8x512xf32>
    %78 = tpu.matmul %72, %77, %cst_28 {dimension_numbers = #tpu.dot_dimension_numbers<[1], [0], [0], [1], [0, 0, 1, 1], [], []>} : vector<8x128xf32>, vector<128x512xf32>, vector<8x512xf32> -> vector<8x512xf32>
    %79 = arith.addf %76, %78 : vector<8x512xf32>
    %80 = vector.extract_strided_slice %79 {offsets = [0, 0], sizes = [8, 128], strides = [1, 1]} : vector<8x512xf32> to vector<8x128xf32>
    %81 = arith.negf %80 : vector<8x128xf32>
    %82 = math.exp %81 : vector<8x128xf32>
    %cst_29 = arith.constant 1.000000e+00 : f32
    %83 = vector.broadcast %cst_29 : f32 to vector<8x128xf32>
    %84 = arith.addf %83, %82 : vector<8x128xf32>
    %85 = arith.divf %83, %84 : vector<8x128xf32>
    %86 = vector.extract_strided_slice %79 {offsets = [0, 128], sizes = [8, 128], strides = [1, 1]} : vector<8x512xf32> to vector<8x128xf32>
    %87 = arith.negf %86 : vector<8x128xf32>
    %88 = math.exp %87 : vector<8x128xf32>
    %cst_30 = arith.constant 1.000000e+00 : f32
    %89 = vector.broadcast %cst_30 : f32 to vector<8x128xf32>
    %90 = arith.addf %89, %88 : vector<8x128xf32>
    %91 = arith.divf %89, %90 : vector<8x128xf32>
    %92 = vector.extract_strided_slice %79 {offsets = [0, 256], sizes = [8, 128], strides = [1, 1]} : vector<8x512xf32> to vector<8x128xf32>
    %93 = math.tanh %92 : vector<8x128xf32>
    %94 = vector.extract_strided_slice %79 {offsets = [0, 384], sizes = [8, 128], strides = [1, 1]} : vector<8x512xf32> to vector<8x128xf32>
    %95 = arith.negf %94 : vector<8x128xf32>
    %96 = math.exp %95 : vector<8x128xf32>
    %cst_31 = arith.constant 1.000000e+00 : f32
    %97 = vector.broadcast %cst_31 : f32 to vector<8x128xf32>
    %98 = arith.addf %97, %96 : vector<8x128xf32>
    %99 = arith.divf %97, %98 : vector<8x128xf32>
    %100 = arith.mulf %91, %70 : vector<8x128xf32>
    %101 = arith.mulf %85, %93 : vector<8x128xf32>
    %102 = arith.addf %100, %101 : vector<8x128xf32>
    %103 = math.tanh %102 : vector<8x128xf32>
    %104 = arith.mulf %99, %103 : vector<8x128xf32>
    %c3_i32 = arith.constant 3 : i32
    %c8_i32_32 = arith.constant 8 : i32
    %105 = arith.muli %c3_i32, %c8_i32_32 : i32
    %106 = tpu.assume_multiple %105, 8 : i32
    %107 = arith.index_cast %106 : i32 to index
    %c0_33 = arith.constant 0 : index
    %108 = vector.load %arg7[%107, %c0_33] : memref<64x512xf32, #tpu.memory_space<vmem>>, vector<8x512xf32>
    %c0_34 = arith.constant 0 : index
    %c0_35 = arith.constant 0 : index
    %109 = vector.load %arg2[%c0_34, %c0_35] : memref<128x512xf32, #tpu.memory_space<vmem>>, vector<128x512xf32>
    %cst_36 = arith.constant dense<0.000000e+00> : vector<8x512xf32>
    %110 = tpu.matmul %104, %109, %cst_36 {dimension_numbers = #tpu.dot_dimension_numbers<[1], [0], [0], [1], [0, 0, 1, 1], [], []>} : vector<8x128xf32>, vector<128x512xf32>, vector<8x512xf32> -> vector<8x512xf32>
    %111 = arith.addf %108, %110 : vector<8x512xf32>
    %112 = vector.extract_strided_slice %111 {offsets = [0, 0], sizes = [8, 128], strides = [1, 1]} : vector<8x512xf32> to vector<8x128xf32>
    %113 = arith.negf %112 : vector<8x128xf32>
    %114 = math.exp %113 : vector<8x128xf32>
    %cst_37 = arith.constant 1.000000e+00 : f32
    %115 = vector.broadcast %cst_37 : f32 to vector<8x128xf32>
    %116 = arith.addf %115, %114 : vector<8x128xf32>
    %117 = arith.divf %115, %116 : vector<8x128xf32>
    %118 = vector.extract_strided_slice %111 {offsets = [0, 128], sizes = [8, 128], strides = [1, 1]} : vector<8x512xf32> to vector<8x128xf32>
    %119 = arith.negf %118 : vector<8x128xf32>
    %120 = math.exp %119 : vector<8x128xf32>
    %cst_38 = arith.constant 1.000000e+00 : f32
    %121 = vector.broadcast %cst_38 : f32 to vector<8x128xf32>
    %122 = arith.addf %121, %120 : vector<8x128xf32>
    %123 = arith.divf %121, %122 : vector<8x128xf32>
    %124 = vector.extract_strided_slice %111 {offsets = [0, 256], sizes = [8, 128], strides = [1, 1]} : vector<8x512xf32> to vector<8x128xf32>
    %125 = math.tanh %124 : vector<8x128xf32>
    %126 = vector.extract_strided_slice %111 {offsets = [0, 384], sizes = [8, 128], strides = [1, 1]} : vector<8x512xf32> to vector<8x128xf32>
    %127 = arith.negf %126 : vector<8x128xf32>
    %128 = math.exp %127 : vector<8x128xf32>
    %cst_39 = arith.constant 1.000000e+00 : f32
    %129 = vector.broadcast %cst_39 : f32 to vector<8x128xf32>
    %130 = arith.addf %129, %128 : vector<8x128xf32>
    %131 = arith.divf %129, %130 : vector<8x128xf32>
    %132 = arith.mulf %123, %102 : vector<8x128xf32>
    %133 = arith.mulf %117, %125 : vector<8x128xf32>
    %134 = arith.addf %132, %133 : vector<8x128xf32>
    %135 = math.tanh %134 : vector<8x128xf32>
    %136 = arith.mulf %131, %135 : vector<8x128xf32>
    %c4_i32 = arith.constant 4 : i32
    %c8_i32_40 = arith.constant 8 : i32
    %137 = arith.muli %c4_i32, %c8_i32_40 : i32
    %138 = tpu.assume_multiple %137, 8 : i32
    %139 = arith.index_cast %138 : i32 to index
    %c0_41 = arith.constant 0 : index
    %140 = vector.load %arg7[%139, %c0_41] : memref<64x512xf32, #tpu.memory_space<vmem>>, vector<8x512xf32>
    %c0_42 = arith.constant 0 : index
    %c0_43 = arith.constant 0 : index
    %141 = vector.load %arg2[%c0_42, %c0_43] : memref<128x512xf32, #tpu.memory_space<vmem>>, vector<128x512xf32>
    %cst_44 = arith.constant dense<0.000000e+00> : vector<8x512xf32>
    %142 = tpu.matmul %136, %141, %cst_44 {dimension_numbers = #tpu.dot_dimension_numbers<[1], [0], [0], [1], [0, 0, 1, 1], [], []>} : vector<8x128xf32>, vector<128x512xf32>, vector<8x512xf32> -> vector<8x512xf32>
    %143 = arith.addf %140, %142 : vector<8x512xf32>
    %144 = vector.extract_strided_slice %143 {offsets = [0, 0], sizes = [8, 128], strides = [1, 1]} : vector<8x512xf32> to vector<8x128xf32>
    %145 = arith.negf %144 : vector<8x128xf32>
    %146 = math.exp %145 : vector<8x128xf32>
    %cst_45 = arith.constant 1.000000e+00 : f32
    %147 = vector.broadcast %cst_45 : f32 to vector<8x128xf32>
    %148 = arith.addf %147, %146 : vector<8x128xf32>
    %149 = arith.divf %147, %148 : vector<8x128xf32>
    %150 = vector.extract_strided_slice %143 {offsets = [0, 128], sizes = [8, 128], strides = [1, 1]} : vector<8x512xf32> to vector<8x128xf32>
    %151 = arith.negf %150 : vector<8x128xf32>
    %152 = math.exp %151 : vector<8x128xf32>
    %cst_46 = arith.constant 1.000000e+00 : f32
    %153 = vector.broadcast %cst_46 : f32 to vector<8x128xf32>
    %154 = arith.addf %153, %152 : vector<8x128xf32>
    %155 = arith.divf %153, %154 : vector<8x128xf32>
    %156 = vector.extract_strided_slice %143 {offsets = [0, 256], sizes = [8, 128], strides = [1, 1]} : vector<8x512xf32> to vector<8x128xf32>
    %157 = math.tanh %156 : vector<8x128xf32>
    %158 = vector.extract_strided_slice %143 {offsets = [0, 384], sizes = [8, 128], strides = [1, 1]} : vector<8x512xf32> to vector<8x128xf32>
    %159 = arith.negf %158 : vector<8x128xf32>
    %160 = math.exp %159 : vector<8x128xf32>
    %cst_47 = arith.constant 1.000000e+00 : f32
    %161 = vector.broadcast %cst_47 : f32 to vector<8x128xf32>
    %162 = arith.addf %161, %160 : vector<8x128xf32>
    %163 = arith.divf %161, %162 : vector<8x128xf32>
    %164 = arith.mulf %155, %134 : vector<8x128xf32>
    %165 = arith.mulf %149, %157 : vector<8x128xf32>
    %166 = arith.addf %164, %165 : vector<8x128xf32>
    %167 = math.tanh %166 : vector<8x128xf32>
    %168 = arith.mulf %163, %167 : vector<8x128xf32>
    %c5_i32 = arith.constant 5 : i32
    %c8_i32_48 = arith.constant 8 : i32
    %169 = arith.muli %c5_i32, %c8_i32_48 : i32
    %170 = tpu.assume_multiple %169, 8 : i32
    %171 = arith.index_cast %170 : i32 to index
    %c0_49 = arith.constant 0 : index
    %172 = vector.load %arg7[%171, %c0_49] : memref<64x512xf32, #tpu.memory_space<vmem>>, vector<8x512xf32>
    %c0_50 = arith.constant 0 : index
    %c0_51 = arith.constant 0 : index
    %173 = vector.load %arg2[%c0_50, %c0_51] : memref<128x512xf32, #tpu.memory_space<vmem>>, vector<128x512xf32>
    %cst_52 = arith.constant dense<0.000000e+00> : vector<8x512xf32>
    %174 = tpu.matmul %168, %173, %cst_52 {dimension_numbers = #tpu.dot_dimension_numbers<[1], [0], [0], [1], [0, 0, 1, 1], [], []>} : vector<8x128xf32>, vector<128x512xf32>, vector<8x512xf32> -> vector<8x512xf32>
    %175 = arith.addf %172, %174 : vector<8x512xf32>
    %176 = vector.extract_strided_slice %175 {offsets = [0, 0], sizes = [8, 128], strides = [1, 1]} : vector<8x512xf32> to vector<8x128xf32>
    %177 = arith.negf %176 : vector<8x128xf32>
    %178 = math.exp %177 : vector<8x128xf32>
    %cst_53 = arith.constant 1.000000e+00 : f32
    %179 = vector.broadcast %cst_53 : f32 to vector<8x128xf32>
    %180 = arith.addf %179, %178 : vector<8x128xf32>
    %181 = arith.divf %179, %180 : vector<8x128xf32>
    %182 = vector.extract_strided_slice %175 {offsets = [0, 128], sizes = [8, 128], strides = [1, 1]} : vector<8x512xf32> to vector<8x128xf32>
    %183 = arith.negf %182 : vector<8x128xf32>
    %184 = math.exp %183 : vector<8x128xf32>
    %cst_54 = arith.constant 1.000000e+00 : f32
    %185 = vector.broadcast %cst_54 : f32 to vector<8x128xf32>
    %186 = arith.addf %185, %184 : vector<8x128xf32>
    %187 = arith.divf %185, %186 : vector<8x128xf32>
    %188 = vector.extract_strided_slice %175 {offsets = [0, 256], sizes = [8, 128], strides = [1, 1]} : vector<8x512xf32> to vector<8x128xf32>
    %189 = math.tanh %188 : vector<8x128xf32>
    %190 = vector.extract_strided_slice %175 {offsets = [0, 384], sizes = [8, 128], strides = [1, 1]} : vector<8x512xf32> to vector<8x128xf32>
    %191 = arith.negf %190 : vector<8x128xf32>
    %192 = math.exp %191 : vector<8x128xf32>
    %cst_55 = arith.constant 1.000000e+00 : f32
    %193 = vector.broadcast %cst_55 : f32 to vector<8x128xf32>
    %194 = arith.addf %193, %192 : vector<8x128xf32>
    %195 = arith.divf %193, %194 : vector<8x128xf32>
    %196 = arith.mulf %187, %166 : vector<8x128xf32>
    %197 = arith.mulf %181, %189 : vector<8x128xf32>
    %198 = arith.addf %196, %197 : vector<8x128xf32>
    %199 = math.tanh %198 : vector<8x128xf32>
    %200 = arith.mulf %195, %199 : vector<8x128xf32>
    %c6_i32 = arith.constant 6 : i32
    %c8_i32_56 = arith.constant 8 : i32
    %201 = arith.muli %c6_i32, %c8_i32_56 : i32
    %202 = tpu.assume_multiple %201, 8 : i32
    %203 = arith.index_cast %202 : i32 to index
    %c0_57 = arith.constant 0 : index
    %204 = vector.load %arg7[%203, %c0_57] : memref<64x512xf32, #tpu.memory_space<vmem>>, vector<8x512xf32>
    %c0_58 = arith.constant 0 : index
    %c0_59 = arith.constant 0 : index
    %205 = vector.load %arg2[%c0_58, %c0_59] : memref<128x512xf32, #tpu.memory_space<vmem>>, vector<128x512xf32>
    %cst_60 = arith.constant dense<0.000000e+00> : vector<8x512xf32>
    %206 = tpu.matmul %200, %205, %cst_60 {dimension_numbers = #tpu.dot_dimension_numbers<[1], [0], [0], [1], [0, 0, 1, 1], [], []>} : vector<8x128xf32>, vector<128x512xf32>, vector<8x512xf32> -> vector<8x512xf32>
    %207 = arith.addf %204, %206 : vector<8x512xf32>
    %208 = vector.extract_strided_slice %207 {offsets = [0, 0], sizes = [8, 128], strides = [1, 1]} : vector<8x512xf32> to vector<8x128xf32>
    %209 = arith.negf %208 : vector<8x128xf32>
    %210 = math.exp %209 : vector<8x128xf32>
    %cst_61 = arith.constant 1.000000e+00 : f32
    %211 = vector.broadcast %cst_61 : f32 to vector<8x128xf32>
    %212 = arith.addf %211, %210 : vector<8x128xf32>
    %213 = arith.divf %211, %212 : vector<8x128xf32>
    %214 = vector.extract_strided_slice %207 {offsets = [0, 128], sizes = [8, 128], strides = [1, 1]} : vector<8x512xf32> to vector<8x128xf32>
    %215 = arith.negf %214 : vector<8x128xf32>
    %216 = math.exp %215 : vector<8x128xf32>
    %cst_62 = arith.constant 1.000000e+00 : f32
    %217 = vector.broadcast %cst_62 : f32 to vector<8x128xf32>
    %218 = arith.addf %217, %216 : vector<8x128xf32>
    %219 = arith.divf %217, %218 : vector<8x128xf32>
    %220 = vector.extract_strided_slice %207 {offsets = [0, 256], sizes = [8, 128], strides = [1, 1]} : vector<8x512xf32> to vector<8x128xf32>
    %221 = math.tanh %220 : vector<8x128xf32>
    %222 = vector.extract_strided_slice %207 {offsets = [0, 384], sizes = [8, 128], strides = [1, 1]} : vector<8x512xf32> to vector<8x128xf32>
    %223 = arith.negf %222 : vector<8x128xf32>
    %224 = math.exp %223 : vector<8x128xf32>
    %cst_63 = arith.constant 1.000000e+00 : f32
    %225 = vector.broadcast %cst_63 : f32 to vector<8x128xf32>
    %226 = arith.addf %225, %224 : vector<8x128xf32>
    %227 = arith.divf %225, %226 : vector<8x128xf32>
    %228 = arith.mulf %219, %198 : vector<8x128xf32>
    %229 = arith.mulf %213, %221 : vector<8x128xf32>
    %230 = arith.addf %228, %229 : vector<8x128xf32>
    %231 = math.tanh %230 : vector<8x128xf32>
    %232 = arith.mulf %227, %231 : vector<8x128xf32>
    %c7_i32 = arith.constant 7 : i32
    %c8_i32_64 = arith.constant 8 : i32
    %233 = arith.muli %c7_i32, %c8_i32_64 : i32
    %234 = tpu.assume_multiple %233, 8 : i32
    %235 = arith.index_cast %234 : i32 to index
    %c0_65 = arith.constant 0 : index
    %236 = vector.load %arg7[%235, %c0_65] : memref<64x512xf32, #tpu.memory_space<vmem>>, vector<8x512xf32>
    %c0_66 = arith.constant 0 : index
    %c0_67 = arith.constant 0 : index
    %237 = vector.load %arg2[%c0_66, %c0_67] : memref<128x512xf32, #tpu.memory_space<vmem>>, vector<128x512xf32>
    %cst_68 = arith.constant dense<0.000000e+00> : vector<8x512xf32>
    %238 = tpu.matmul %232, %237, %cst_68 {dimension_numbers = #tpu.dot_dimension_numbers<[1], [0], [0], [1], [0, 0, 1, 1], [], []>} : vector<8x128xf32>, vector<128x512xf32>, vector<8x512xf32> -> vector<8x512xf32>
    %239 = arith.addf %236, %238 : vector<8x512xf32>
    %240 = vector.extract_strided_slice %239 {offsets = [0, 0], sizes = [8, 128], strides = [1, 1]} : vector<8x512xf32> to vector<8x128xf32>
    %241 = arith.negf %240 : vector<8x128xf32>
    %242 = math.exp %241 : vector<8x128xf32>
    %cst_69 = arith.constant 1.000000e+00 : f32
    %243 = vector.broadcast %cst_69 : f32 to vector<8x128xf32>
    %244 = arith.addf %243, %242 : vector<8x128xf32>
    %245 = arith.divf %243, %244 : vector<8x128xf32>
    %246 = vector.extract_strided_slice %239 {offsets = [0, 128], sizes = [8, 128], strides = [1, 1]} : vector<8x512xf32> to vector<8x128xf32>
    %247 = arith.negf %246 : vector<8x128xf32>
    %248 = math.exp %247 : vector<8x128xf32>
    %cst_70 = arith.constant 1.000000e+00 : f32
    %249 = vector.broadcast %cst_70 : f32 to vector<8x128xf32>
    %250 = arith.addf %249, %248 : vector<8x128xf32>
    %251 = arith.divf %249, %250 : vector<8x128xf32>
    %252 = vector.extract_strided_slice %239 {offsets = [0, 256], sizes = [8, 128], strides = [1, 1]} : vector<8x512xf32> to vector<8x128xf32>
    %253 = math.tanh %252 : vector<8x128xf32>
    %254 = vector.extract_strided_slice %239 {offsets = [0, 384], sizes = [8, 128], strides = [1, 1]} : vector<8x512xf32> to vector<8x128xf32>
    %255 = arith.negf %254 : vector<8x128xf32>
    %256 = math.exp %255 : vector<8x128xf32>
    %cst_71 = arith.constant 1.000000e+00 : f32
    %257 = vector.broadcast %cst_71 : f32 to vector<8x128xf32>
    %258 = arith.addf %257, %256 : vector<8x128xf32>
    %259 = arith.divf %257, %258 : vector<8x128xf32>
    %260 = arith.mulf %251, %230 : vector<8x128xf32>
    %261 = arith.mulf %245, %253 : vector<8x128xf32>
    %262 = arith.addf %260, %261 : vector<8x128xf32>
    %263 = math.tanh %262 : vector<8x128xf32>
    %264 = arith.mulf %259, %263 : vector<8x128xf32>
    %c8_i32_72 = arith.constant 8 : i32
    %c0_73 = arith.constant 0 : index
    %c0_74 = arith.constant 0 : index
    %265 = vector.load %arg4[%c0_73, %c0_74] : memref<128x128xf32, #tpu.memory_space<vmem>>, vector<128x128xf32>
    %cst_75 = arith.constant dense<0.000000e+00> : vector<8x128xf32>
    %266 = tpu.matmul %264, %265, %cst_75 {dimension_numbers = #tpu.dot_dimension_numbers<[1], [0], [0], [1], [0, 0, 1, 1], [], []>} : vector<8x128xf32>, vector<128x128xf32>, vector<8x128xf32> -> vector<8x128xf32>
    %c0_76 = arith.constant 0 : index
    %c0_77 = arith.constant 0 : index
    %267 = vector.load %arg5[%c0_76, %c0_77] : memref<1x128xf32, #tpu.memory_space<vmem>>, vector<1x128xf32>
    %268 = vector.broadcast %267 : vector<1x128xf32> to vector<8x128xf32>
    %269 = arith.addf %266, %268 : vector<8x128xf32>
    %c0_78 = arith.constant 0 : index
    %c0_79 = arith.constant 0 : index
    %270 = vector.load %arg6[%c0_78, %c0_79] : memref<8x128xf32, #tpu.memory_space<vmem>>, vector<8x128xf32>
    tpu.vector_store %arg6[%c0_78, %c0_79], %269 {strides = array<i32>} : memref<8x128xf32, #tpu.memory_space<vmem>>, vector<8x128xf32>,
    return
  }
}

</mosaic_0001>

<bundles_post_ra>
// kernel: tpu_custom_call.1
= control target key start
LH: loop header
LB: loop body
LE: loop exit
PB: predicated region body
PF: predicated region fallthrough
CT: control target
= control target key end

     0   :  { %11 = vsyncpa [#allocation4], 0  ;;  %s3455_s0 = inlined_call_operand.vmem [shape: f32[64,16], index: 0, kind: input, shape index: {}]   ;;  %s3456_s1 = inlined_call_operand.vmem [shape: f32[16,512], index: 1, kind: input, shape index: {}]   ;;  %s3457_s2 = inlined_call_operand.hbm [shape: f32[128,512], index: 2, kind: input, shape index: {}]   ;;  %s3458_s3 = inlined_call_operand.vmem [shape: f32[1,512], index: 3, kind: input, shape index: {}]   ;;  %s3459_s4 = inlined_call_operand.hbm [shape: f32[128,128], index: 4, kind: input, shape index: {}]   ;;  %s3460_s5 = inlined_call_operand.vmem [shape: f32[1,128], index: 5, kind: input, shape index: {}]   ;;  %s3461_s6 = inlined_call_operand.hbm [shape: f32[8,128], index: 6, kind: output, shape index: {}]  }
   0x1   :  { %12 = vsyncpa [#allocation7], 0 }
   0x2   :  { %13 = vsyncpa [#allocation5], 0  ;;  %s2881_s21 = smov [#allocation3]   ;;  %s2809_s25 = scalar_lea.hbm %s3457_s2, 8192 }
   0x3   :  { %s23_s22 = sshll.u32 %s2881_s21, 4  ;;  %p2810_p0 = scmp.ne.s32.totalorder %s3457_s2, %s2809_s25  ;;  %s24_s22 = int_to_ptr.vmem [resolvable:$true] %s23_s22 }
   0x4   :  { %p2813_p1 = scmp.lt.u32.totalorder %s2809_s25, %s3457_s2 }
   0x6   :  { %p2815_p2 = pnand %p2813_p1, %p2810_p0 }
   0x8   :  { %2818 = shalt.err (!%p2815_p2)
}
   0x9   :  { %s2819_s30 = scalar_lea.vmem %s24_s22, 8192  ;;  %p2824_p4 = scmp.lt.s32.totalorder %s24_s22, %s24_s22 }
   0xa   :  { %p2820_p3 = scmp.ne.s32.totalorder %s24_s22, %s2819_s30  ;;  %p2825_p5 = scmp.lt.s32.totalorder %s2819_s30, %s2819_s30 }
   0xc   :  { %p2826_p6 = por %p2825_p5, %p2824_p4 }
   0xe   :  { %p2827_p7 = pnand %p2826_p6, %p2820_p3 }
  0x10   :  { %2830 = shalt.err (!%p2827_p7)
}
  0x11   :  { %s2882_s7 = smov 512   ;;  %s2883_s8 = smov 32  }
  0x12   :  { %29 = dma.hbm_to_vmem [thread:$0]  %s3457_s2, 8192, %s24_s22, [#allocation4], %s2882_s7, %s2882_s7, %s2883_s8  }
  0x13   :  { %s2884_s11 = smov [#allocation6]   ;;  %s2831_s15 = scalar_lea.hbm %s3459_s4, 2048 }
  0x14   :  { %s37_s12 = sshll.u32 %s2884_s11, 4  ;;  %p2832_p8 = scmp.ne.s32.totalorder %s3459_s4, %s2831_s15  ;;  %s38_s12 = int_to_ptr.vmem [resolvable:$true] %s37_s12 }
  0x15   :  { %p2835_p9 = scmp.lt.u32.totalorder %s2831_s15, %s3459_s4 }
  0x17   :  { %p2837_p10 = pnand %p2835_p9, %p2832_p8 }
  0x19   :  { %2840 = shalt.err (!%p2837_p10)
}
  0x1a   :  { %s2841_s20 = scalar_lea.vmem %s38_s12, 2048  ;;  %p2846_p12 = scmp.lt.s32.totalorder %s38_s12, %s38_s12 }
  0x1b   :  { %p2842_p11 = scmp.ne.s32.totalorder %s38_s12, %s2841_s20  ;;  %p2847_p13 = scmp.lt.s32.totalorder %s2841_s20, %s2841_s20 }
  0x1d   :  { %p2848_p0 = por %p2847_p13, %p2846_p12 }
  0x1f   :  { %p2849_p1 = pnand %p2848_p0, %p2842_p11 }
  0x21   :  { %2852 = shalt.err (!%p2849_p1)
}
  0x22   :  { %s2885_s2 = smov 128   ;;  %s2886_s21 = smov 8  }
  0x23   :  { %43 = dma.hbm_to_vmem [thread:$0]  %s3459_s4, 2048, %s38_s12, [#allocation7], %s2885_s2, %s2885_s2, %s2886_s21  }
  0x24   :  { %2875 = dma.done.wait [#allocation4], 8192  }
  0x25   :  { %2876 = vsyncadd [#allocation4], 4294959104 }
  0x26   :  { %2877 = dma.done.wait [#allocation7], 2048  }
  0x27   :  { %2878 = vsyncadd [#allocation7], 4294965248  ;;  %v2887_v0 = vmov 0.0   ;;  %v61_v1 = vld [vmem:[%s3456_s1 + $0x8] sm:$0xff]  ;;  %v63_v3 = vld [vmem:[%s3456_s1 + $0x18] sm:$0xff]  ;;  %vm90_vm0 = vcmask 130048  }
  0x28   :  { %179 = vmatprep.mubr.f32.mxu0 %v2887_v0  ;;  %292 = vmatprep.mubr.f32.mxu1 %v2887_v0  ;;  %v65_v2 = vld [vmem:[%s3456_s1 + $0x28] sm:$0xff]  ;;  %v67_v5 = vld [vmem:[%s3456_s1 + $0x38] sm:$0xff]  ;;  %v60_v6 = vld [vmem:[%s3456_s1] sm:$0xff]  ;;  %vm2889_vm1 = vmmov 0   ;;  %s2890_s30 = smov [#allocation8]  }
  0x29   :  { %v2063_v4 = vpack.c.bf16 %v65_v2, %v61_v1  ;;  %v64_v7 = vld [vmem:[%s3456_s1 + $0x20] sm:$0xff]  ;;  %v2067_v8 = vpack.c.bf16 %v67_v5, %v63_v3  ;;  %v62_v10 = vld [vmem:[%s3456_s1 + $0x10] sm:$0xff]  ;;  %v381_v14 = vld [vmem:[#allocation3 + $0x8] sm:$0xff]  ;;  %s1953_s7 = sshll.u32 %s2890_s30, 4  ;;  %s1954_s7 = int_to_ptr.vmem [resolvable:$true] %s1953_s7 }
  0x2a   :  { %v2065_v9 = vpack.c.bf16 %v64_v7, %v60_v6  ;;  %v66_v11 = vld [vmem:[%s3456_s1 + $0x30] sm:$0xff]  ;;  %v52_v12 = vld [vmem:[%s3455_s0] sm:$0xff]  ;;  %v385_v15 = vld [vmem:[#allocation3 + $0x28] sm:$0xff]  ;;  %s2853_s8 = scalar_lea.vmem %s1954_s7, 128  ;;  %p2858_p3 = scmp.lt.s32.totalorder %s1954_s7, %s1954_s7 }
  0x2b   :  { %2064 = vmatprep.subr.bf16.mxu0 %v2063_v4  ;;  %v2069_v13 = vpack.c.bf16 %v66_v11, %v62_v10  ;;  %v383_v16 = vld [vmem:[#allocation3 + $0x18] sm:$0xff]  ;;  %2068 = vmatprep.subr.bf16.mxu1 %v2067_v8  ;;  %v2979_v17 = vpack.c.bf16 %v385_v15, %v381_v14  ;;  %v380_v19 = vld [vmem:[#allocation3] sm:$0xff]  ;;  %v382_v23 = vld [vmem:[#allocation3 + $0x10] sm:$0xff]  ;;  %p2854_p2 = scmp.ne.s32.totalorder %s1954_s7, %s2853_s8  ;;  %p2859_p4 = scmp.lt.s32.totalorder %s2853_s8, %s2853_s8 }
  0x2c   :  { %2066 = vmatpush1.bf16.msra.mxu0 %v2065_v9  ;;  %v387_v18 = vld [vmem:[#allocation3 + $0x38] sm:$0xff]  ;;  %v384_v20 = vld [vmem:[#allocation3 + $0x20] sm:$0xff]  ;;  %v386_v24 = vld [vmem:[#allocation3 + $0x30] sm:$0xff] }
  0x2d   :  { %2070 = vmatpush1.bf16.msra.mxu1 %v2069_v13  ;;  %v2981_v21 = vpack.c.bf16 %v387_v18, %v383_v16  ;;  %v2983_v22 = vpack.c.bf16 %v384_v20, %v380_v19  ;;  %2072 = vmatprep.subr.bf16.mxu0 %v2979_v17  ;;  %v2986_v25 = vpack.c.bf16 %v386_v24, %v382_v23  ;;  %v389_v26 = vld [vmem:[#allocation3 + $0x48] sm:$0xff]  ;;  %v391_v28 = vld [vmem:[#allocation3 + $0x58] sm:$0xff]  ;;  %v388_v31 = vld [vmem:[#allocation3 + $0x40] sm:$0xff]  ;;  %p2860_p5 = por %p2859_p4, %p2858_p3 }
  0x2e   :  { %v393_v27 = vld [vmem:[#allocation3 + $0x68] sm:$0xff]  ;;  %v395_v30 = vld [vmem:[#allocation3 + $0x78] sm:$0xff]  ;;  %v392_v32 = vld [vmem:[#allocation3 + $0x60] sm:$0xff] }
  0x2f   :  { %1970 = vmatmul.mubr.msk.f32.vlgmr.msra.gmra.mrb[0].mxu0 %vm90_vm0, %v52_v12  ;;  %2104 = vmatprep.subr.bf16.mxu1 %v2981_v21  ;;  %v2990_v29 = vpack.c.bf16 %v393_v27, %v389_v26  ;;  %v53_v33 = vld [vmem:[%s3455_s0 + $0x8] sm:$0xff]  ;;  %v2997_v34 = vpack.c.bf16 %v395_v30, %v391_v28  ;;  %v2999_v35 = vpack.c.bf16 %v392_v32, %v388_v31  ;;  %v390_v36 = vld [vmem:[#allocation3 + $0x50] sm:$0xff]  ;;  %v399_v41 = vld [vmem:[#allocation3 + $0x98] sm:$0xff]  ;;  %p2861_p6 = pnand %p2860_p5, %p2854_p2 }
  0x30   :  { %1978 = vmatmul.mubr.msk.f32.vlgmr.msra.gmra.mrb[0].mxu1 %vm90_vm0, %v52_v12  ;;  %2074 = vmatpush1.bf16.msra.mxu0 %v2983_v22  ;;  %v394_v37 = vld [vmem:[#allocation3 + $0x70] sm:$0xff]  ;;  %v397_v39 = vld [vmem:[#allocation3 + $0x88] sm:$0xff]  ;;  %v403_v43 = vld [vmem:[#allocation3 + $0xb8] sm:$0xff] }
  0x31   :  { %2106 = vmatpush1.bf16.msra.mxu1 %v2986_v25  ;;  %185 = vmatprep.mubr.f32.mxu0 %v2887_v0  ;;  %v3003_v38 = vpack.c.bf16 %v394_v37, %v390_v36  ;;  %v401_v40 = vld [vmem:[#allocation3 + $0xa8] sm:$0xff]  ;;  %v396_v44 = vld [vmem:[#allocation3 + $0x80] sm:$0xff]  ;;  %v54_v46 = vld [vmem:[%s3455_s0 + $0x10] sm:$0xff]  ;;  %v3014_v47 = vpack.c.bf16 %v403_v43, %v399_v41 }
  0x32   :  { %298 = vmatprep.mubr.f32.mxu1 %v2887_v0  ;;  %2076 = vmatprep.subr.bf16.mxu0 %v2990_v29  ;;  %v3007_v42 = vpack.c.bf16 %v401_v40, %v397_v39  ;;  %v400_v45 = vld [vmem:[#allocation3 + $0xa0] sm:$0xff]  ;;  %v398_v48 = vld [vmem:[#allocation3 + $0x90] sm:$0xff]  ;;  %v405_v51 = vld [vmem:[#allocation3 + $0xc8] sm:$0xff] }
  0x33   :  { %1971 = vmatmul.mubr.msk.f32.gmra.mrb[2].mxu0 %vm90_vm0, %v53_v33  ;;  %2108 = vmatprep.subr.bf16.mxu1 %v2997_v34  ;;  %v402_v49 = vld [vmem:[#allocation3 + $0xb0] sm:$0xff]  ;;  %v3018_v50 = vpack.c.bf16 %v400_v45, %v396_v44  ;;  %v409_v52 = vld [vmem:[#allocation3 + $0xe8] sm:$0xff]  ;;  %v407_v53 = vld [vmem:[#allocation3 + $0xd8] sm:$0xff] }
  0x34   :  { %1979 = vmatmul.mubr.msk.f32.gmra.mrb[2].mxu1 %vm90_vm0, %v53_v33  ;;  %2078 = vmatpush1.bf16.msra.mxu0 %v2999_v35  ;;  %v3022_v54 = vpack.c.bf16 %v402_v49, %v398_v48  ;;  %v411_v55 = vld [vmem:[#allocation3 + $0xf8] sm:$0xff]  ;;  %v404_v56 = vld [vmem:[#allocation3 + $0xc0] sm:$0xff]  ;;  %v3026_v58 = vpack.c.bf16 %v409_v52, %v405_v51  ;;  %v406_v59 = vld [vmem:[#allocation3 + $0xd0] sm:$0xff] }
  0x35   :  { %2110 = vmatpush1.bf16.msra.mxu1 %v3003_v38  ;;  %191 = vmatprep.mubr.f32.mxu0 %v2887_v0  ;;  %v408_v57 = vld [vmem:[#allocation3 + $0xe0] sm:$0xff]  ;;  %v410_v60 = vld [vmem:[#allocation3 + $0xf0] sm:$0xff]  ;;  %v3030_v61 = vpack.c.bf16 %v411_v55, %v407_v53  ;;  %v413_v62 = vld [vmem:[#allocation3 + $0x108] sm:$0xff] }
  0x36   :  { %304 = vmatprep.mubr.f32.mxu1 %v2887_v0  ;;  %2080 = vmatprep.subr.bf16.mxu0 %v3007_v42  ;;  %v417_v63 = vld [vmem:[#allocation3 + $0x128] sm:$0xff]  ;;  %v55_v1 = vld [vmem:[%s3455_s0 + $0x18] sm:$0xff]  ;;  %v3037_v2 = vpack.c.bf16 %v408_v57, %v404_v56  ;;  %v3041_v5 = vpack.c.bf16 %v410_v60, %v406_v59  ;;  %v412_v6 = vld [vmem:[#allocation3 + $0x100] sm:$0xff] }
  0x37   :  { %1972 = vmatmul.mubr.msk.f32.gmra.mrb[4].mxu0 %vm90_vm0, %v54_v46  ;;  %2112 = vmatprep.subr.bf16.mxu1 %v3014_v47  ;;  %v415_v3 = vld [vmem:[#allocation3 + $0x118] sm:$0xff]  ;;  %v416_v7 = vld [vmem:[#allocation3 + $0x120] sm:$0xff]  ;;  %v3045_v8 = vpack.c.bf16 %v417_v63, %v413_v62  ;;  %v414_v9 = vld [vmem:[#allocation3 + $0x110] sm:$0xff] }
  0x38   :  { %1980 = vmatmul.mubr.msk.f32.gmra.mrb[4].mxu1 %vm90_vm0, %v54_v46  ;;  %2082 = vmatpush1.bf16.msra.mxu0 %v3018_v50  ;;  %v419_v4 = vld [vmem:[#allocation3 + $0x138] sm:$0xff]  ;;  %v418_v10 = vld [vmem:[#allocation3 + $0x130] sm:$0xff]  ;;  %v421_v12 = vld [vmem:[#allocation3 + $0x148] sm:$0xff]  ;;  %v3056_v15 = vpack.c.bf16 %v416_v7, %v412_v6  ;;  %v70_v7 = vlaneseq }
  0x39   :  { %2114 = vmatpush1.bf16.msra.mxu1 %v3022_v54  ;;  %197 = vmatprep.mubr.f32.mxu0 %v2887_v0  ;;  %v3049_v11 = vpack.c.bf16 %v419_v4, %v415_v3  ;;  %v425_v13 = vld [vmem:[#allocation3 + $0x168] sm:$0xff]  ;;  %v56_v14 = vld [vmem:[%s3455_s0 + $0x20] sm:$0xff]  ;;  %v423_v16 = vld [vmem:[#allocation3 + $0x158] sm:$0xff]  ;;  %v3060_v19 = vpack.c.bf16 %v418_v10, %v414_v9 }
  0x3a   :  { %310 = vmatprep.mubr.f32.mxu1 %v2887_v0  ;;  %2084 = vmatprep.subr.bf16.mxu0 %v3026_v58  ;;  %v427_v18 = vld [vmem:[#allocation3 + $0x178] sm:$0xff]  ;;  %v420_v20 = vld [vmem:[#allocation3 + $0x140] sm:$0xff]  ;;  %v3064_v24 = vpack.c.bf16 %v425_v13, %v421_v12  ;;  %v422_v26 = vld [vmem:[#allocation3 + $0x150] sm:$0xff]  ;;  %v71_v9 = vshrl.u32 %v70_v7, 7 }
  0x3b   :  { %1973 = vmatmul.mubr.msk.f32.gmra.mrb[6].mxu0 %vm90_vm0, %v55_v1  ;;  %2116 = vmatprep.subr.bf16.mxu1 %v3030_v61  ;;  %v424_v23 = vld [vmem:[#allocation3 + $0x160] sm:$0xff]  ;;  %v426_v27 = vld [vmem:[#allocation3 + $0x170] sm:$0xff]  ;;  %v3068_v28 = vpack.c.bf16 %v427_v18, %v423_v16  ;;  %v429_v30 = vld [vmem:[#allocation3 + $0x188] sm:$0xff] }
  0x3c   :  { %1981 = vmatmul.mubr.msk.f32.gmra.mrb[6].mxu1 %vm90_vm0, %v55_v1  ;;  %2086 = vmatpush1.bf16.msra.mxu0 %v3037_v2  ;;  %v433_v31 = vld [vmem:[#allocation3 + $0x1a8] sm:$0xff]  ;;  %v3075_v33 = vpack.c.bf16 %v424_v23, %v420_v20  ;;  %v431_v36 = vld [vmem:[#allocation3 + $0x198] sm:$0xff]  ;;  %v3079_v39 = vpack.c.bf16 %v426_v27, %v422_v26  ;;  %v428_v40 = vld [vmem:[#allocation3 + $0x180] sm:$0xff]  ;;  %v72_v10 = vsub.s32 0, %v71_v9  ;;  %v76_v13 = vsub.s32 1, %v71_v9 }
  0x3d   :  { %2118 = vmatpush1.bf16.msra.mxu1 %v3041_v5  ;;  %203 = vmatprep.mubr.f32.mxu0 %v2887_v0  ;;  %v57_v32 = vld [vmem:[%s3455_s0 + $0x28] sm:$0xff]  ;;  %v435_v37 = vld [vmem:[#allocation3 + $0x1b8] sm:$0xff]  ;;  %v432_v41 = vld [vmem:[#allocation3 + $0x1a0] sm:$0xff]  ;;  %v3083_v43 = vpack.c.bf16 %v433_v31, %v429_v30  ;;  %v84_v20 = vsub.s32 3, %v71_v9 }
  0x3e   :  { %316 = vmatprep.mubr.f32.mxu1 %v2887_v0  ;;  %2088 = vmatprep.subr.bf16.mxu0 %v3045_v8  ;;  %v430_v44 = vld [vmem:[#allocation3 + $0x190] sm:$0xff]  ;;  %v3087_v46 = vpack.c.bf16 %v435_v37, %v431_v36  ;;  %v437_v48 = vld [vmem:[#allocation3 + $0x1c8] sm:$0xff]  ;;  %v3094_v52 = vpack.c.bf16 %v432_v41, %v428_v40  ;;  %v439_v53 = vld [vmem:[#allocation3 + $0x1d8] sm:$0xff]  ;;  %v80_v40 = vsub.s32 2, %v71_v9 }
  0x3f   :  { %1974 = vmatmul.mubr.msk.f32.gmra.mrb[8].mxu0 %vm90_vm0, %v56_v14  ;;  %2120 = vmatprep.subr.bf16.mxu1 %v3049_v11  ;;  %v434_v45 = vld [vmem:[#allocation3 + $0x1b0] sm:$0xff]  ;;  %v441_v49 = vld [vmem:[#allocation3 + $0x1e8] sm:$0xff]  ;;  %v443_v55 = vld [vmem:[#allocation3 + $0x1f8] sm:$0xff] }
  0x40   :  { %1982 = vmatmul.mubr.msk.f32.gmra.mrb[8].mxu1 %vm90_vm0, %v56_v14  ;;  %2090 = vmatpush1.bf16.msra.mxu0 %v3056_v15  ;;  %v58_v51 = vld [vmem:[%s3455_s0 + $0x30] sm:$0xff]  ;;  %v3098_v56 = vpack.c.bf16 %v434_v45, %v430_v44  ;;  %v436_v57 = vld [vmem:[#allocation3 + $0x1c0] sm:$0xff]  ;;  %v3102_v60 = vpack.c.bf16 %v441_v49, %v437_v48  ;;  %v3106_v1 = vpack.c.bf16 %v443_v55, %v439_v53  ;;  %v59_v3 = vld [vmem:[%s3455_s0 + $0x38] sm:$0xff] }
  0x41   :  { %2122 = vmatpush1.bf16.msra.mxu1 %v3060_v19  ;;  %209 = vmatprep.mubr.f32.mxu0 %v2887_v0  ;;  %v440_v59 = vld [vmem:[#allocation3 + $0x1e0] sm:$0xff]  ;;  %v438_v62 = vld [vmem:[#allocation3 + $0x1d0] sm:$0xff] }
  0x42   :  { %322 = vmatprep.mubr.f32.mxu1 %v2887_v0  ;;  %2092 = vmatprep.subr.bf16.mxu0 %v3064_v24  ;;  %v442_v63 = vld [vmem:[#allocation3 + $0x1f0] sm:$0xff]  ;;  %v3113_v4 = vpack.c.bf16 %v440_v59, %v436_v57  ;;  %v68_v12 = vld [vmem:[%s3458_s3] sm:$0xf] }
  0x43   :  { %1975 = vmatmul.mubr.msk.f32.gmra.mrb[10].mxu0 %vm90_vm0, %v57_v32  ;;  %2124 = vmatprep.subr.bf16.mxu1 %v3068_v28  ;;  %v3117_v6 = vpack.c.bf16 %v442_v63, %v438_v62  ;;  %v3169_v14 = vrot.slane %v68_v12, %v72_v10  ;;  %v3171_v16 = vrot.slane %v68_v12, %v76_v13 }
  0x44   :  { %1983 = vmatmul.mubr.msk.f32.gmra.mrb[10].mxu1 %vm90_vm0, %v57_v32  ;;  %2094 = vmatpush1.bf16.msra.mxu0 %v3075_v33  ;;  %v3175_v37 = vrot.slane %v68_v12, %v84_v20  ;;  %v3178_v44 = vrot.slane %v68_v12, %v80_v40 }
  0x45   :  { %2126 = vmatpush1.bf16.msra.mxu1 %v3079_v39  ;;  %215 = vmatprep.mubr.f32.mxu0 %v2887_v0 }
  0x46   :  { %328 = vmatprep.mubr.f32.mxu1 %v2887_v0  ;;  %2096 = vmatprep.subr.bf16.mxu0 %v3083_v43 }
  0x47   :  { %1976 = vmatmul.mubr.msk.f32.gmra.mrb[12].mxu0 %vm90_vm0, %v58_v51  ;;  %2128 = vmatprep.subr.bf16.mxu1 %v3087_v46 }
  0x48   :  { %1984 = vmatmul.mubr.msk.f32.gmra.mrb[12].mxu1 %vm90_vm0, %v58_v51  ;;  %2098 = vmatpush1.bf16.msra.mxu0 %v3094_v52 }
  0x49   :  { %2130 = vmatpush1.bf16.msra.mxu1 %v3098_v56  ;;  %221 = vmatprep.mubr.f32.mxu0 %v2887_v0 }
  0x4a   :  { %334 = vmatprep.mubr.f32.mxu1 %v2887_v0  ;;  %2100 = vmatprep.subr.bf16.mxu0 %v3102_v60 }
  0x4b   :  { %1977 = vmatmul.mubr.msk.f32.gmra.mrb[14].mxu0 %vm90_vm0, %v59_v3  ;;  %2132 = vmatprep.subr.bf16.mxu1 %v3106_v1 }
  0x4c   :  { %1985 = vmatmul.mubr.msk.f32.gmra.mrb[14].mxu1 %vm90_vm0, %v59_v3  ;;  %2102 = vmatpush1.bf16.msra.mxu0 %v3113_v4 }
  0x4d   :  { %2134 = vmatpush1.bf16.msra.mxu1 %v3117_v6  ;;  %508 = vmatprep.mubr.f32.mxu0 %v2887_v0 }
  0x4e   :  { %579 = vmatprep.mubr.f32.mxu1 %v2887_v0  ;;  %2136 = vmatprep.subr.bf16.mxu0 %v2979_v17 }
  0x4f   :  { %509 = vmatmul.mubr.f32.vlgmr.msra.gmra.mrb[0].mxu0 %v2887_v0  ;;  %2168 = vmatprep.subr.bf16.mxu1 %v2981_v21 }
  0x50   :  { %580 = vmatmul.mubr.f32.vlgmr.msra.gmra.mrb[0].mxu1 %v2887_v0  ;;  %2138 = vmatpush1.bf16.msra.mxu0 %v2983_v22 }
  0x51   :  { %2170 = vmatpush1.bf16.msra.mxu1 %v2986_v25  ;;  %2140 = vmatprep.subr.bf16.mxu0 %v2990_v29 }
  0x52   :  { %2172 = vmatprep.subr.bf16.mxu1 %v2997_v34  ;;  %685 = vmatprep.mubr.f32.mxu0 %v2887_v0 }
  0x53   :  { %756 = vmatprep.mubr.f32.mxu1 %v2887_v0 }
  0x54   :  { %2142 = vmatpush1.bf16.msra.mxu0 %v2999_v35 }
  0x55   :  { %2174 = vmatpush1.bf16.msra.mxu1 %v3003_v38  ;;  %2144 = vmatprep.subr.bf16.mxu0 %v3007_v42 }
  0x56   :  { %2176 = vmatprep.subr.bf16.mxu1 %v3014_v47 }
  0x58   :  { %2146 = vmatpush1.bf16.msra.mxu0 %v3018_v50 }
  0x59   :  { %2178 = vmatpush1.bf16.msra.mxu1 %v3022_v54  ;;  %2148 = vmatprep.subr.bf16.mxu0 %v3026_v58 }
  0x5a   :  { %2180 = vmatprep.subr.bf16.mxu1 %v3030_v61 }
  0x5c   :  { %2150 = vmatpush1.bf16.msra.mxu0 %v3037_v2 }
  0x5d   :  { %2182 = vmatpush1.bf16.msra.mxu1 %v3041_v5  ;;  %2152 = vmatprep.subr.bf16.mxu0 %v3045_v8 }
  0x5e   :  { %2184 = vmatprep.subr.bf16.mxu1 %v3049_v11 }
  0x60   :  { %2154 = vmatpush1.bf16.msra.mxu0 %v3056_v15 }
  0x61   :  { %2186 = vmatpush1.bf16.msra.mxu1 %v3060_v19  ;;  %2156 = vmatprep.subr.bf16.mxu0 %v3064_v24 }
  0x62   :  { %2188 = vmatprep.subr.bf16.mxu1 %v3068_v28 }
  0x64   :  { %2158 = vmatpush1.bf16.msra.mxu0 %v3075_v33 }
  0x65   :  { %2190 = vmatpush1.bf16.msra.mxu1 %v3079_v39  ;;  %2160 = vmatprep.subr.bf16.mxu0 %v3083_v43 }
  0x66   :  { %2192 = vmatprep.subr.bf16.mxu1 %v3087_v46 }
  0x68   :  { %2162 = vmatpush1.bf16.msra.mxu0 %v3094_v52 }
  0x69   :  { %2194 = vmatpush1.bf16.msra.mxu1 %v3098_v56  ;;  %2164 = vmatprep.subr.bf16.mxu0 %v3102_v60 }
  0x6a   :  { %2196 = vmatprep.subr.bf16.mxu1 %v3106_v1 }
  0x6c   :  { %2166 = vmatpush1.bf16.msra.mxu0 %v3113_v4 }
  0x6d   :  { %2198 = vmatpush1.bf16.msra.mxu1 %v3117_v6  ;;  %2200 = vmatprep.subr.bf16.mxu0 %v2979_v17 }
  0x6e   :  { %2232 = vmatprep.subr.bf16.mxu1 %v2981_v21 }
 0x122   :  { %v510_v18 = vpop.f32.mrb[0].mxu0 }
 0x123   :  { %v2607_v23 = vadd.f32 %v510_v18, %v3169_v14  ;;  %v581_v26 = vpop.f32.mrb[0].mxu1  ;;  %v512_v27 = vpop.f32.mrb[1].mxu0 }
 0x124   :  { %v2608_v30 = vadd.f32 %v512_v27, %v3171_v16  ;;  %v583_v31 = vpop.f32.mrb[1].mxu1  ;;  %v2623_v48 = vadd.f32 %v581_v26, %v3178_v44 }
 0x125   :  { %v1986_v32 = vmul.f32 -1.442695, %v2607_v23  ;;  %v2624_v41 = vadd.f32 %v583_v31, %v3175_v37 }
 0x126   :  { %v1987_v36 = vmul.f32 -1.442695, %v2608_v30 }
 0x127   :  { %2681 = vpow2.f32 %v1986_v32  ;;  %v1988_v45 = vmul.f32 -1.442695, %v2624_v41 }
 0x128   :  { %2683 = vpow2.f32 %v1987_v36 }
 0x129   :  { %2685 = vpow2.f32 %v1988_v45 }
 0x12a   :  { %2687 = vtanh.f32 %v2623_v48 }
 0x131   :  { %v2682_v49 = vpop.eup %2681 }
 0x132   :  { %v2684_v51 = vpop.eup %2683  ;;  %v593_v53 = vadd.f32 1.0, %v2682_v49 }
 0x133   :  { %v599_v55 = vadd.f32 1.0, %v2684_v51  ;;  %v2686_v57 = vpop.eup %2685 }
 0x134   :  { %2689 = vrcp.f32 %v593_v53  ;;  %v2688_v59 = vpop.eup %2687  ;;  %v606_v7 = vadd.f32 1.0, %v2686_v57 }
 0x135   :  { %2691 = vrcp.f32 %v599_v55 }
 0x136   :  { %2693 = vrcp.f32 %v606_v7 }
 0x13e   :  { %v2690_v62 = vpop.eup %2689 }
 0x13f   :  { %v2692_v63 = vpop.eup %2691  ;;  %v610_v3 = vmul.f32 %v2690_v62, %v2688_v59 }
 0x140   :  { %v609_v9 = vmul.f32 0.0, %v2692_v63  ;;  %v2694_v12 = vpop.eup %2693 }
 0x142   :  { %v3181_v10 = vadd.f32 %v610_v3, %v609_v9 }
 0x144   :  { %2695 = vtanh.f32 %v3181_v10 }
 0x14e   :  { %v2696_v13 = vpop.eup %2695 }
 0x14f   :  { %v613_v18 = vmul.f32 %v2696_v13, %v2694_v12 }
 0x151   :  { %686 = vmatmul.mubr.f32.vlgmr.msra.gmra.mrb[2].mxu0 %v613_v18  ;;  %757 = vmatmul.mubr.f32.vlgmr.msra.gmra.mrb[2].mxu1 %v613_v18 }
 0x152   :  { %2202 = vmatpush1.bf16.msra.mxu0 %v2983_v22  ;;  %2234 = vmatpush1.bf16.msra.mxu1 %v2986_v25 }
 0x153   :  { %2204 = vmatprep.subr.bf16.mxu0 %v2990_v29  ;;  %2236 = vmatprep.subr.bf16.mxu1 %v2997_v34 }
 0x154   :  { %862 = vmatprep.mubr.f32.mxu0 %v2887_v0  ;;  %933 = vmatprep.mubr.f32.mxu1 %v2887_v0 }
 0x156   :  { %2206 = vmatpush1.bf16.msra.mxu0 %v2999_v35  ;;  %2238 = vmatpush1.bf16.msra.mxu1 %v3003_v38 }
 0x157   :  { %2208 = vmatprep.subr.bf16.mxu0 %v3007_v42  ;;  %2240 = vmatprep.subr.bf16.mxu1 %v3014_v47 }
 0x15a   :  { %2210 = vmatpush1.bf16.msra.mxu0 %v3018_v50  ;;  %2242 = vmatpush1.bf16.msra.mxu1 %v3022_v54 }
 0x15b   :  { %2212 = vmatprep.subr.bf16.mxu0 %v3026_v58  ;;  %2244 = vmatprep.subr.bf16.mxu1 %v3030_v61 }
 0x15e   :  { %2214 = vmatpush1.bf16.msra.mxu0 %v3037_v2  ;;  %2246 = vmatpush1.bf16.msra.mxu1 %v3041_v5 }
 0x15f   :  { %2216 = vmatprep.subr.bf16.mxu0 %v3045_v8  ;;  %2248 = vmatprep.subr.bf16.mxu1 %v3049_v11 }
 0x162   :  { %2218 = vmatpush1.bf16.msra.mxu0 %v3056_v15  ;;  %2250 = vmatpush1.bf16.msra.mxu1 %v3060_v19 }
 0x163   :  { %2220 = vmatprep.subr.bf16.mxu0 %v3064_v24  ;;  %2252 = vmatprep.subr.bf16.mxu1 %v3068_v28 }
 0x166   :  { %2222 = vmatpush1.bf16.msra.mxu0 %v3075_v33  ;;  %2254 = vmatpush1.bf16.msra.mxu1 %v3079_v39 }
 0x167   :  { %2224 = vmatprep.subr.bf16.mxu0 %v3083_v43  ;;  %2256 = vmatprep.subr.bf16.mxu1 %v3087_v46 }
 0x16a   :  { %2226 = vmatpush1.bf16.msra.mxu0 %v3094_v52  ;;  %2258 = vmatpush1.bf16.msra.mxu1 %v3098_v56 }
 0x16b   :  { %2228 = vmatprep.subr.bf16.mxu0 %v3102_v60  ;;  %2260 = vmatprep.subr.bf16.mxu1 %v3106_v1 }
 0x16e   :  { %2230 = vmatpush1.bf16.msra.mxu0 %v3113_v4  ;;  %2262 = vmatpush1.bf16.msra.mxu1 %v3117_v6 }
 0x16f   :  { %2264 = vmatprep.subr.bf16.mxu0 %v2979_v17  ;;  %2296 = vmatprep.subr.bf16.mxu1 %v2981_v21 }
 0x224   :  { %v687_v20 = vpop.f32.mrb[2].mxu0  ;;  %v758_v23 = vpop.f32.mrb[2].mxu1 }
 0x225   :  { %v2609_v26 = vadd.f32 %v687_v20, %v3169_v14  ;;  %v689_v27 = vpop.f32.mrb[3].mxu0  ;;  %v760_v30 = vpop.f32.mrb[3].mxu1  ;;  %v2625_v45 = vadd.f32 %v758_v23, %v3178_v44 }
 0x226   :  { %v2610_v31 = vadd.f32 %v689_v27, %v3171_v16  ;;  %v2626_v40 = vadd.f32 %v760_v30, %v3175_v37 }
 0x227   :  { %v1989_v32 = vmul.f32 -1.442695, %v2609_v26 }
 0x228   :  { %v1990_v36 = vmul.f32 -1.442695, %v2610_v31  ;;  %v1991_v41 = vmul.f32 -1.442695, %v2626_v40 }
 0x229   :  { %2697 = vpow2.f32 %v1989_v32 }
 0x22a   :  { %2699 = vpow2.f32 %v1990_v36 }
 0x22b   :  { %2701 = vpow2.f32 %v1991_v41 }
 0x22c   :  { %2703 = vtanh.f32 %v2625_v45 }
 0x233   :  { %v2698_v48 = vpop.eup %2697 }
 0x234   :  { %v2700_v49 = vpop.eup %2699  ;;  %v770_v51 = vadd.f32 1.0, %v2698_v48 }
 0x235   :  { %v776_v53 = vadd.f32 1.0, %v2700_v49  ;;  %v2702_v55 = vpop.eup %2701 }
 0x236   :  { %2705 = vrcp.f32 %v770_v51  ;;  %v2704_v57 = vpop.eup %2703  ;;  %v783_v3 = vadd.f32 1.0, %v2702_v55 }
 0x237   :  { %2707 = vrcp.f32 %v776_v53 }
 0x238   :  { %2709 = vrcp.f32 %v783_v3 }
 0x240   :  { %v2706_v59 = vpop.eup %2705 }
 0x241   :  { %v2708_v62 = vpop.eup %2707  ;;  %v787_v63 = vmul.f32 %v2706_v59, %v2704_v57 }
 0x242   :  { %v786_v7 = vmul.f32 %v2708_v62, %v3181_v10  ;;  %v2710_v12 = vpop.eup %2709 }
 0x244   :  { %v3223_v9 = vadd.f32 %v787_v63, %v786_v7 }
 0x246   :  { %2711 = vtanh.f32 %v3223_v9 }
 0x250   :  { %v2712_v13 = vpop.eup %2711 }
 0x251   :  { %v790_v18 = vmul.f32 %v2712_v13, %v2710_v12 }
 0x253   :  { %863 = vmatmul.mubr.f32.vlgmr.msra.gmra.mrb[4].mxu0 %v790_v18  ;;  %934 = vmatmul.mubr.f32.vlgmr.msra.gmra.mrb[4].mxu1 %v790_v18 }
 0x254   :  { %2266 = vmatpush1.bf16.msra.mxu0 %v2983_v22  ;;  %2298 = vmatpush1.bf16.msra.mxu1 %v2986_v25 }
 0x255   :  { %2268 = vmatprep.subr.bf16.mxu0 %v2990_v29  ;;  %2300 = vmatprep.subr.bf16.mxu1 %v2997_v34 }
 0x256   :  { %1039 = vmatprep.mubr.f32.mxu0 %v2887_v0  ;;  %1110 = vmatprep.mubr.f32.mxu1 %v2887_v0 }
 0x258   :  { %2270 = vmatpush1.bf16.msra.mxu0 %v2999_v35  ;;  %2302 = vmatpush1.bf16.msra.mxu1 %v3003_v38 }
 0x259   :  { %2272 = vmatprep.subr.bf16.mxu0 %v3007_v42  ;;  %2304 = vmatprep.subr.bf16.mxu1 %v3014_v47 }
 0x25c   :  { %2274 = vmatpush1.bf16.msra.mxu0 %v3018_v50  ;;  %2306 = vmatpush1.bf16.msra.mxu1 %v3022_v54 }
 0x25d   :  { %2276 = vmatprep.subr.bf16.mxu0 %v3026_v58  ;;  %2308 = vmatprep.subr.bf16.mxu1 %v3030_v61 }
 0x260   :  { %2278 = vmatpush1.bf16.msra.mxu0 %v3037_v2  ;;  %2310 = vmatpush1.bf16.msra.mxu1 %v3041_v5 }
 0x261   :  { %2280 = vmatprep.subr.bf16.mxu0 %v3045_v8  ;;  %2312 = vmatprep.subr.bf16.mxu1 %v3049_v11 }
 0x264   :  { %2282 = vmatpush1.bf16.msra.mxu0 %v3056_v15  ;;  %2314 = vmatpush1.bf16.msra.mxu1 %v3060_v19 }
 0x265   :  { %2284 = vmatprep.subr.bf16.mxu0 %v3064_v24  ;;  %2316 = vmatprep.subr.bf16.mxu1 %v3068_v28 }
 0x268   :  { %2286 = vmatpush1.bf16.msra.mxu0 %v3075_v33  ;;  %2318 = vmatpush1.bf16.msra.mxu1 %v3079_v39 }
 0x269   :  { %2288 = vmatprep.subr.bf16.mxu0 %v3083_v43  ;;  %2320 = vmatprep.subr.bf16.mxu1 %v3087_v46 }
 0x26c   :  { %2290 = vmatpush1.bf16.msra.mxu0 %v3094_v52  ;;  %2322 = vmatpush1.bf16.msra.mxu1 %v3098_v56 }
 0x26d   :  { %2292 = vmatprep.subr.bf16.mxu0 %v3102_v60  ;;  %2324 = vmatprep.subr.bf16.mxu1 %v3106_v1 }
 0x270   :  { %2294 = vmatpush1.bf16.msra.mxu0 %v3113_v4  ;;  %2326 = vmatpush1.bf16.msra.mxu1 %v3117_v6 }
 0x271   :  { %2328 = vmatprep.subr.bf16.mxu0 %v2979_v17  ;;  %2360 = vmatprep.subr.bf16.mxu1 %v2981_v21 }
 0x326   :  { %v864_v10 = vpop.f32.mrb[4].mxu0  ;;  %v935_v20 = vpop.f32.mrb[4].mxu1 }
 0x327   :  { %v2611_v23 = vadd.f32 %v864_v10, %v3169_v14  ;;  %v866_v26 = vpop.f32.mrb[5].mxu0  ;;  %v937_v27 = vpop.f32.mrb[5].mxu1  ;;  %v2627_v41 = vadd.f32 %v935_v20, %v3178_v44 }
 0x328   :  { %v2612_v30 = vadd.f32 %v866_v26, %v3171_v16  ;;  %v2628_v36 = vadd.f32 %v937_v27, %v3175_v37 }
 0x329   :  { %v1992_v31 = vmul.f32 -1.442695, %v2611_v23 }
 0x32a   :  { %v1993_v32 = vmul.f32 -1.442695, %v2612_v30  ;;  %v1994_v40 = vmul.f32 -1.442695, %v2628_v36 }
 0x32b   :  { %2713 = vpow2.f32 %v1992_v31 }
 0x32c   :  { %2715 = vpow2.f32 %v1993_v32 }
 0x32d   :  { %2717 = vpow2.f32 %v1994_v40 }
 0x32e   :  { %2719 = vtanh.f32 %v2627_v41 }
 0x335   :  { %v2714_v45 = vpop.eup %2713 }
 0x336   :  { %v2716_v48 = vpop.eup %2715  ;;  %v947_v49 = vadd.f32 1.0, %v2714_v45 }
 0x337   :  { %v953_v51 = vadd.f32 1.0, %v2716_v48  ;;  %v2718_v53 = vpop.eup %2717 }
 0x338   :  { %2721 = vrcp.f32 %v947_v49  ;;  %v2720_v55 = vpop.eup %2719  ;;  %v960_v63 = vadd.f32 1.0, %v2718_v53 }
 0x339   :  { %2723 = vrcp.f32 %v953_v51 }
 0x33a   :  { %2725 = vrcp.f32 %v960_v63 }
 0x342   :  { %v2722_v57 = vpop.eup %2721 }
 0x343   :  { %v2724_v59 = vpop.eup %2723  ;;  %v964_v62 = vmul.f32 %v2722_v57, %v2720_v55 }
 0x344   :  { %v963_v3 = vmul.f32 %v2724_v59, %v3223_v9  ;;  %v2726_v12 = vpop.eup %2725 }
 0x346   :  { %v3265_v7 = vadd.f32 %v964_v62, %v963_v3 }
 0x348   :  { %2727 = vtanh.f32 %v3265_v7 }
 0x352   :  { %v2728_v13 = vpop.eup %2727 }
 0x353   :  { %v967_v18 = vmul.f32 %v2728_v13, %v2726_v12 }
 0x355   :  { %1040 = vmatmul.mubr.f32.vlgmr.msra.gmra.mrb[6].mxu0 %v967_v18  ;;  %1111 = vmatmul.mubr.f32.vlgmr.msra.gmra.mrb[6].mxu1 %v967_v18 }
 0x356   :  { %2330 = vmatpush1.bf16.msra.mxu0 %v2983_v22  ;;  %2362 = vmatpush1.bf16.msra.mxu1 %v2986_v25 }
 0x357   :  { %2332 = vmatprep.subr.bf16.mxu0 %v2990_v29  ;;  %2364 = vmatprep.subr.bf16.mxu1 %v2997_v34 }
 0x358   :  { %1216 = vmatprep.mubr.f32.mxu0 %v2887_v0  ;;  %1287 = vmatprep.mubr.f32.mxu1 %v2887_v0 }
 0x35a   :  { %2334 = vmatpush1.bf16.msra.mxu0 %v2999_v35  ;;  %2366 = vmatpush1.bf16.msra.mxu1 %v3003_v38 }
 0x35b   :  { %2336 = vmatprep.subr.bf16.mxu0 %v3007_v42  ;;  %2368 = vmatprep.subr.bf16.mxu1 %v3014_v47 }
 0x35e   :  { %2338 = vmatpush1.bf16.msra.mxu0 %v3018_v50  ;;  %2370 = vmatpush1.bf16.msra.mxu1 %v3022_v54 }
 0x35f   :  { %2340 = vmatprep.subr.bf16.mxu0 %v3026_v58  ;;  %2372 = vmatprep.subr.bf16.mxu1 %v3030_v61 }
 0x362   :  { %2342 = vmatpush1.bf16.msra.mxu0 %v3037_v2  ;;  %2374 = vmatpush1.bf16.msra.mxu1 %v3041_v5 }
 0x363   :  { %2344 = vmatprep.subr.bf16.mxu0 %v3045_v8  ;;  %2376 = vmatprep.subr.bf16.mxu1 %v3049_v11 }
 0x366   :  { %2346 = vmatpush1.bf16.msra.mxu0 %v3056_v15  ;;  %2378 = vmatpush1.bf16.msra.mxu1 %v3060_v19 }
 0x367   :  { %2348 = vmatprep.subr.bf16.mxu0 %v3064_v24  ;;  %2380 = vmatprep.subr.bf16.mxu1 %v3068_v28 }
 0x36a   :  { %2350 = vmatpush1.bf16.msra.mxu0 %v3075_v33  ;;  %2382 = vmatpush1.bf16.msra.mxu1 %v3079_v39 }
 0x36b   :  { %2352 = vmatprep.subr.bf16.mxu0 %v3083_v43  ;;  %2384 = vmatprep.subr.bf16.mxu1 %v3087_v46 }
 0x36e   :  { %2354 = vmatpush1.bf16.msra.mxu0 %v3094_v52  ;;  %2386 = vmatpush1.bf16.msra.mxu1 %v3098_v56 }
 0x36f   :  { %2356 = vmatprep.subr.bf16.mxu0 %v3102_v60  ;;  %2388 = vmatprep.subr.bf16.mxu1 %v3106_v1 }
 0x372   :  { %2358 = vmatpush1.bf16.msra.mxu0 %v3113_v4  ;;  %2390 = vmatpush1.bf16.msra.mxu1 %v3117_v6 }
 0x373   :  { %2392 = vmatprep.subr.bf16.mxu0 %v2979_v17  ;;  %2424 = vmatprep.subr.bf16.mxu1 %v2981_v21 }
 0x428   :  { %v1041_v9 = vpop.f32.mrb[6].mxu0  ;;  %v1112_v10 = vpop.f32.mrb[6].mxu1 }
 0x429   :  { %v2613_v20 = vadd.f32 %v1041_v9, %v3169_v14  ;;  %v1043_v23 = vpop.f32.mrb[7].mxu0  ;;  %v1114_v26 = vpop.f32.mrb[7].mxu1  ;;  %v2629_v40 = vadd.f32 %v1112_v10, %v3178_v44 }
 0x42a   :  { %v2614_v27 = vadd.f32 %v1043_v23, %v3171_v16  ;;  %v2630_v32 = vadd.f32 %v1114_v26, %v3175_v37 }
 0x42b   :  { %v1995_v30 = vmul.f32 -1.442695, %v2613_v20 }
 0x42c   :  { %v1996_v31 = vmul.f32 -1.442695, %v2614_v27  ;;  %v1997_v36 = vmul.f32 -1.442695, %v2630_v32 }
 0x42d   :  { %2729 = vpow2.f32 %v1995_v30 }
 0x42e   :  { %2731 = vpow2.f32 %v1996_v31 }
 0x42f   :  { %2733 = vpow2.f32 %v1997_v36 }
 0x430   :  { %2735 = vtanh.f32 %v2629_v40 }
 0x437   :  { %v2730_v41 = vpop.eup %2729 }
 0x438   :  { %v2732_v45 = vpop.eup %2731  ;;  %v1124_v48 = vadd.f32 1.0, %v2730_v41 }
 0x439   :  { %v1130_v49 = vadd.f32 1.0, %v2732_v45  ;;  %v2734_v51 = vpop.eup %2733 }
 0x43a   :  { %2737 = vrcp.f32 %v1124_v48  ;;  %v2736_v53 = vpop.eup %2735  ;;  %v1137_v62 = vadd.f32 1.0, %v2734_v51 }
 0x43b   :  { %2739 = vrcp.f32 %v1130_v49 }
 0x43c   :  { %2741 = vrcp.f32 %v1137_v62 }
 0x444   :  { %v2738_v55 = vpop.eup %2737 }
 0x445   :  { %v2740_v57 = vpop.eup %2739  ;;  %v1141_v59 = vmul.f32 %v2738_v55, %v2736_v53 }
 0x446   :  { %v1140_v63 = vmul.f32 %v2740_v57, %v3265_v7  ;;  %v2742_v12 = vpop.eup %2741 }
 0x448   :  { %v3307_v3 = vadd.f32 %v1141_v59, %v1140_v63 }
 0x44a   :  { %2743 = vtanh.f32 %v3307_v3 }
 0x454   :  { %v2744_v13 = vpop.eup %2743 }
 0x455   :  { %v1144_v18 = vmul.f32 %v2744_v13, %v2742_v12 }
 0x457   :  { %1217 = vmatmul.mubr.f32.vlgmr.msra.gmra.mrb[8].mxu0 %v1144_v18  ;;  %1288 = vmatmul.mubr.f32.vlgmr.msra.gmra.mrb[8].mxu1 %v1144_v18 }
 0x458   :  { %2394 = vmatpush1.bf16.msra.mxu0 %v2983_v22  ;;  %2426 = vmatpush1.bf16.msra.mxu1 %v2986_v25 }
 0x459   :  { %2396 = vmatprep.subr.bf16.mxu0 %v2990_v29  ;;  %2428 = vmatprep.subr.bf16.mxu1 %v2997_v34 }
 0x45a   :  { %1393 = vmatprep.mubr.f32.mxu0 %v2887_v0  ;;  %1464 = vmatprep.mubr.f32.mxu1 %v2887_v0 }
 0x45c   :  { %2398 = vmatpush1.bf16.msra.mxu0 %v2999_v35  ;;  %2430 = vmatpush1.bf16.msra.mxu1 %v3003_v38 }
 0x45d   :  { %2400 = vmatprep.subr.bf16.mxu0 %v3007_v42  ;;  %2432 = vmatprep.subr.bf16.mxu1 %v3014_v47 }
 0x460   :  { %2402 = vmatpush1.bf16.msra.mxu0 %v3018_v50  ;;  %2434 = vmatpush1.bf16.msra.mxu1 %v3022_v54 }
 0x461   :  { %2404 = vmatprep.subr.bf16.mxu0 %v3026_v58  ;;  %2436 = vmatprep.subr.bf16.mxu1 %v3030_v61 }
 0x464   :  { %2406 = vmatpush1.bf16.msra.mxu0 %v3037_v2  ;;  %2438 = vmatpush1.bf16.msra.mxu1 %v3041_v5 }
 0x465   :  { %2408 = vmatprep.subr.bf16.mxu0 %v3045_v8  ;;  %2440 = vmatprep.subr.bf16.mxu1 %v3049_v11 }
 0x468   :  { %2410 = vmatpush1.bf16.msra.mxu0 %v3056_v15  ;;  %2442 = vmatpush1.bf16.msra.mxu1 %v3060_v19 }
 0x469   :  { %2412 = vmatprep.subr.bf16.mxu0 %v3064_v24  ;;  %2444 = vmatprep.subr.bf16.mxu1 %v3068_v28 }
 0x46c   :  { %2414 = vmatpush1.bf16.msra.mxu0 %v3075_v33  ;;  %2446 = vmatpush1.bf16.msra.mxu1 %v3079_v39 }
 0x46d   :  { %2416 = vmatprep.subr.bf16.mxu0 %v3083_v43  ;;  %2448 = vmatprep.subr.bf16.mxu1 %v3087_v46 }
 0x470   :  { %2418 = vmatpush1.bf16.msra.mxu0 %v3094_v52  ;;  %2450 = vmatpush1.bf16.msra.mxu1 %v3098_v56 }
 0x471   :  { %2420 = vmatprep.subr.bf16.mxu0 %v3102_v60  ;;  %2452 = vmatprep.subr.bf16.mxu1 %v3106_v1 }
 0x474   :  { %2422 = vmatpush1.bf16.msra.mxu0 %v3113_v4  ;;  %2454 = vmatpush1.bf16.msra.mxu1 %v3117_v6 }
 0x475   :  { %2456 = vmatprep.subr.bf16.mxu0 %v2979_v17  ;;  %2488 = vmatprep.subr.bf16.mxu1 %v2981_v21 }
 0x52a   :  { %v1218_v7 = vpop.f32.mrb[8].mxu0  ;;  %v1289_v9 = vpop.f32.mrb[8].mxu1 }
 0x52b   :  { %v2615_v10 = vadd.f32 %v1218_v7, %v3169_v14  ;;  %v1220_v20 = vpop.f32.mrb[9].mxu0  ;;  %v1291_v23 = vpop.f32.mrb[9].mxu1  ;;  %v2631_v36 = vadd.f32 %v1289_v9, %v3178_v44 }
 0x52c   :  { %v2616_v26 = vadd.f32 %v1220_v20, %v3171_v16  ;;  %v2632_v31 = vadd.f32 %v1291_v23, %v3175_v37 }
 0x52d   :  { %v1998_v27 = vmul.f32 -1.442695, %v2615_v10 }
 0x52e   :  { %v1999_v30 = vmul.f32 -1.442695, %v2616_v26  ;;  %v2000_v32 = vmul.f32 -1.442695, %v2632_v31 }
 0x52f   :  { %2745 = vpow2.f32 %v1998_v27 }
 0x530   :  { %2747 = vpow2.f32 %v1999_v30 }
 0x531   :  { %2749 = vpow2.f32 %v2000_v32 }
 0x532   :  { %2751 = vtanh.f32 %v2631_v36 }
 0x539   :  { %v2746_v40 = vpop.eup %2745 }
 0x53a   :  { %v2748_v41 = vpop.eup %2747  ;;  %v1301_v45 = vadd.f32 1.0, %v2746_v40 }
 0x53b   :  { %v1307_v48 = vadd.f32 1.0, %v2748_v41  ;;  %v2750_v49 = vpop.eup %2749 }
 0x53c   :  { %2753 = vrcp.f32 %v1301_v45  ;;  %v2752_v51 = vpop.eup %2751  ;;  %v1314_v59 = vadd.f32 1.0, %v2750_v49 }
 0x53d   :  { %2755 = vrcp.f32 %v1307_v48 }
 0x53e   :  { %2757 = vrcp.f32 %v1314_v59 }
 0x546   :  { %v2754_v53 = vpop.eup %2753 }
 0x547   :  { %v2756_v55 = vpop.eup %2755  ;;  %v1318_v57 = vmul.f32 %v2754_v53, %v2752_v51 }
 0x548   :  { %v1317_v62 = vmul.f32 %v2756_v55, %v3307_v3  ;;  %v2758_v12 = vpop.eup %2757 }
 0x54a   :  { %v3349_v63 = vadd.f32 %v1318_v57, %v1317_v62 }
 0x54c   :  { %2759 = vtanh.f32 %v3349_v63 }
 0x556   :  { %v2760_v13 = vpop.eup %2759 }
 0x557   :  { %v1321_v18 = vmul.f32 %v2760_v13, %v2758_v12  ;;  %v1856_v13 = vld [vmem:[#allocation6 + $0x18] sm:$0xff] }
 0x559   :  { %1394 = vmatmul.mubr.f32.vlgmr.msra.gmra.mrb[10].mxu0 %v1321_v18  ;;  %1465 = vmatmul.mubr.f32.vlgmr.msra.gmra.mrb[10].mxu1 %v1321_v18 }
 0x55a   :  { %2458 = vmatpush1.bf16.msra.mxu0 %v2983_v22  ;;  %2490 = vmatpush1.bf16.msra.mxu1 %v2986_v25 }
 0x55b   :  { %2460 = vmatprep.subr.bf16.mxu0 %v2990_v29  ;;  %2492 = vmatprep.subr.bf16.mxu1 %v2997_v34 }
 0x55c   :  { %1570 = vmatprep.mubr.f32.mxu0 %v2887_v0  ;;  %1641 = vmatprep.mubr.f32.mxu1 %v2887_v0 }
 0x55e   :  { %2462 = vmatpush1.bf16.msra.mxu0 %v2999_v35  ;;  %2494 = vmatpush1.bf16.msra.mxu1 %v3003_v38 }
 0x55f   :  { %2464 = vmatprep.subr.bf16.mxu0 %v3007_v42  ;;  %2496 = vmatprep.subr.bf16.mxu1 %v3014_v47 }
 0x562   :  { %2466 = vmatpush1.bf16.msra.mxu0 %v3018_v50  ;;  %2498 = vmatpush1.bf16.msra.mxu1 %v3022_v54 }
 0x563   :  { %2468 = vmatprep.subr.bf16.mxu0 %v3026_v58  ;;  %2500 = vmatprep.subr.bf16.mxu1 %v3030_v61 }
 0x566   :  { %2470 = vmatpush1.bf16.msra.mxu0 %v3037_v2  ;;  %2502 = vmatpush1.bf16.msra.mxu1 %v3041_v5 }
 0x567   :  { %2472 = vmatprep.subr.bf16.mxu0 %v3045_v8  ;;  %2504 = vmatprep.subr.bf16.mxu1 %v3049_v11 }
 0x56a   :  { %2474 = vmatpush1.bf16.msra.mxu0 %v3056_v15  ;;  %2506 = vmatpush1.bf16.msra.mxu1 %v3060_v19 }
 0x56b   :  { %2476 = vmatprep.subr.bf16.mxu0 %v3064_v24  ;;  %2508 = vmatprep.subr.bf16.mxu1 %v3068_v28 }
 0x56e   :  { %2478 = vmatpush1.bf16.msra.mxu0 %v3075_v33  ;;  %2510 = vmatpush1.bf16.msra.mxu1 %v3079_v39 }
 0x56f   :  { %2480 = vmatprep.subr.bf16.mxu0 %v3083_v43  ;;  %2512 = vmatprep.subr.bf16.mxu1 %v3087_v46 }
 0x572   :  { %2482 = vmatpush1.bf16.msra.mxu0 %v3094_v52  ;;  %2514 = vmatpush1.bf16.msra.mxu1 %v3098_v56 }
 0x573   :  { %2484 = vmatprep.subr.bf16.mxu0 %v3102_v60  ;;  %2516 = vmatprep.subr.bf16.mxu1 %v3106_v1 }
 0x576   :  { %2486 = vmatpush1.bf16.msra.mxu0 %v3113_v4  ;;  %2518 = vmatpush1.bf16.msra.mxu1 %v3117_v6 }
 0x577   :  { %2520 = vmatprep.subr.bf16.mxu0 %v2979_v17  ;;  %2552 = vmatprep.subr.bf16.mxu1 %v2981_v21 }
 0x62c   :  { %v1395_v3 = vpop.f32.mrb[10].mxu0  ;;  %v1466_v7 = vpop.f32.mrb[10].mxu1 }
 0x62d   :  { %v2617_v9 = vadd.f32 %v1395_v3, %v3169_v14  ;;  %v1397_v10 = vpop.f32.mrb[11].mxu0  ;;  %v1468_v20 = vpop.f32.mrb[11].mxu1  ;;  %v2633_v32 = vadd.f32 %v1466_v7, %v3178_v44  ;;  %v1857_v3 = vld [vmem:[#allocation6 + $0x20] sm:$0xff]  ;;  %v1858_v7 = vld [vmem:[#allocation6 + $0x28] sm:$0xff] }
 0x62e   :  { %v2618_v23 = vadd.f32 %v1397_v10, %v3171_v16  ;;  %v2634_v30 = vadd.f32 %v1468_v20, %v3175_v37  ;;  %v1859_v10 = vld [vmem:[#allocation6 + $0x30] sm:$0xff]  ;;  %v1860_v20 = vld [vmem:[#allocation6 + $0x38] sm:$0xff] }
 0x62f   :  { %v2001_v26 = vmul.f32 -1.442695, %v2617_v9  ;;  %v2590_v9 = vpack.c.bf16 %v1858_v7, %v1857_v3 }
 0x630   :  { %v2002_v27 = vmul.f32 -1.442695, %v2618_v23  ;;  %v2003_v31 = vmul.f32 -1.442695, %v2634_v30  ;;  %v2593_v23 = vpack.c.bf16 %v1860_v20, %v1859_v10 }
 0x631   :  { %2761 = vpow2.f32 %v2001_v26  ;;  %v1861_v26 = vld [vmem:[#allocation6 + $0x40] sm:$0xff] }
 0x632   :  { %2763 = vpow2.f32 %v2002_v27  ;;  %v1862_v27 = vld [vmem:[#allocation6 + $0x48] sm:$0xff] }
 0x633   :  { %2765 = vpow2.f32 %v2003_v31  ;;  %v2596_v30 = vpack.c.bf16 %v1862_v27, %v1861_v26  ;;  %v1863_v31 = vld [vmem:[#allocation6 + $0x50] sm:$0xff] }
 0x634   :  { %2767 = vtanh.f32 %v2633_v32  ;;  %v1864_v32 = vld [vmem:[#allocation6 + $0x58] sm:$0xff] }
 0x63b   :  { %v2762_v17 = vpop.eup %2761 }
 0x63c   :  { %v2764_v36 = vpop.eup %2763  ;;  %v1478_v21 = vadd.f32 1.0, %v2762_v17  ;;  %v1865_v17 = vld [vmem:[#allocation6 + $0x60] sm:$0xff] }
 0x63d   :  { %v1484_v40 = vadd.f32 1.0, %v2764_v36  ;;  %v2766_v41 = vpop.eup %2765  ;;  %v2599_v36 = vpack.c.bf16 %v1864_v32, %v1863_v31 }
 0x63e   :  { %2769 = vrcp.f32 %v1478_v21  ;;  %v2768_v45 = vpop.eup %2767  ;;  %v1491_v53 = vadd.f32 1.0, %v2766_v41  ;;  %v1866_v21 = vld [vmem:[#allocation6 + $0x68] sm:$0xff]  ;;  %v1867_v41 = vld [vmem:[#allocation6 + $0x70] sm:$0xff] }
 0x63f   :  { %2771 = vrcp.f32 %v1484_v40  ;;  %v2602_v40 = vpack.c.bf16 %v1866_v21, %v1865_v17 }
 0x640   :  { %2773 = vrcp.f32 %v1491_v53 }
 0x648   :  { %v2770_v48 = vpop.eup %2769 }
 0x649   :  { %v2772_v49 = vpop.eup %2771  ;;  %v1495_v51 = vmul.f32 %v2770_v48, %v2768_v45  ;;  %v1868_v45 = vld [vmem:[#allocation6 + $0x78] sm:$0xff] }
 0x64a   :  { %v1494_v55 = vmul.f32 %v2772_v49, %v3349_v63  ;;  %v2774_v59 = vpop.eup %2773  ;;  %v1855_v63 = vld [vmem:[#allocation6 + $0x10] sm:$0xff]  ;;  %v2605_v48 = vpack.c.bf16 %v1868_v45, %v1867_v41 }
 0x64b   :  { %v2587_v18 = vpack.c.bf16 %v1856_v13, %v1855_v63 }
 0x64c   :  { %v3391_v57 = vadd.f32 %v1495_v51, %v1494_v55 }
 0x64e   :  { %2775 = vtanh.f32 %v3391_v57 }
 0x658   :  { %v2776_v62 = vpop.eup %2775 }
 0x659   :  { %v1498_v12 = vmul.f32 %v2776_v62, %v2774_v59 }
 0x65b   :  { %1571 = vmatmul.mubr.f32.vlgmr.msra.gmra.mrb[12].mxu0 %v1498_v12  ;;  %1642 = vmatmul.mubr.f32.vlgmr.msra.gmra.mrb[12].mxu1 %v1498_v12 }
 0x65c   :  { %2522 = vmatpush1.bf16.msra.mxu0 %v2983_v22  ;;  %2554 = vmatpush1.bf16.msra.mxu1 %v2986_v25 }
 0x65d   :  { %2524 = vmatprep.subr.bf16.mxu0 %v2990_v29  ;;  %2556 = vmatprep.subr.bf16.mxu1 %v2997_v34 }
 0x65e   :  { %1747 = vmatprep.mubr.f32.mxu0 %v2887_v0  ;;  %1818 = vmatprep.mubr.f32.mxu1 %v2887_v0 }
 0x660   :  { %2526 = vmatpush1.bf16.msra.mxu0 %v2999_v35  ;;  %2558 = vmatpush1.bf16.msra.mxu1 %v3003_v38 }
 0x661   :  { %2528 = vmatprep.subr.bf16.mxu0 %v3007_v42  ;;  %2560 = vmatprep.subr.bf16.mxu1 %v3014_v47 }
 0x664   :  { %2530 = vmatpush1.bf16.msra.mxu0 %v3018_v50  ;;  %2562 = vmatpush1.bf16.msra.mxu1 %v3022_v54 }
 0x665   :  { %2532 = vmatprep.subr.bf16.mxu0 %v3026_v58  ;;  %2564 = vmatprep.subr.bf16.mxu1 %v3030_v61 }
 0x668   :  { %2534 = vmatpush1.bf16.msra.mxu0 %v3037_v2  ;;  %2566 = vmatpush1.bf16.msra.mxu1 %v3041_v5 }
 0x669   :  { %2536 = vmatprep.subr.bf16.mxu0 %v3045_v8  ;;  %2568 = vmatprep.subr.bf16.mxu1 %v3049_v11 }
 0x66c   :  { %2538 = vmatpush1.bf16.msra.mxu0 %v3056_v15  ;;  %2570 = vmatpush1.bf16.msra.mxu1 %v3060_v19 }
 0x66d   :  { %2540 = vmatprep.subr.bf16.mxu0 %v3064_v24  ;;  %2572 = vmatprep.subr.bf16.mxu1 %v3068_v28 }
 0x670   :  { %2542 = vmatpush1.bf16.msra.mxu0 %v3075_v33  ;;  %2574 = vmatpush1.bf16.msra.mxu1 %v3079_v39 }
 0x671   :  { %2544 = vmatprep.subr.bf16.mxu0 %v3083_v43  ;;  %2576 = vmatprep.subr.bf16.mxu1 %v3087_v46 }
 0x674   :  { %2546 = vmatpush1.bf16.msra.mxu0 %v3094_v52  ;;  %2578 = vmatpush1.bf16.msra.mxu1 %v3098_v56 }
 0x675   :  { %2548 = vmatprep.subr.bf16.mxu0 %v3102_v60  ;;  %2580 = vmatprep.subr.bf16.mxu1 %v3106_v1  ;;  %v1853_v60 = vld [vmem:[#allocation6] sm:$0xff]  ;;  %v1854_v1 = vld [vmem:[#allocation6 + $0x8] sm:$0xff] }
 0x678   :  { %2550 = vmatpush1.bf16.msra.mxu0 %v3113_v4  ;;  %2582 = vmatpush1.bf16.msra.mxu1 %v3117_v6  ;;  %v2584_v4 = vpack.c.bf16 %v1854_v1, %v1853_v60  ;;  %v2888_v6 = vmov 0.0|0.0  }
 0x679   :  { %2583 = vmatprep.subr.bf16.mxu0 %v2888_v6 }
 0x72e   :  { %v1572_v22 = vpop.f32.mrb[12].mxu0  ;;  %v1643_v25 = vpop.f32.mrb[12].mxu1 }
 0x72f   :  { %v2619_v29 = vadd.f32 %v1572_v22, %v3169_v14  ;;  %v1574_v34 = vpop.f32.mrb[13].mxu0  ;;  %v1645_v35 = vpop.f32.mrb[13].mxu1  ;;  %v2635_v58 = vadd.f32 %v1643_v25, %v3178_v44 }
 0x730   :  { %v2620_v38 = vadd.f32 %v1574_v34, %v3171_v16  ;;  %v2636_v50 = vadd.f32 %v1645_v35, %v3175_v37 }
 0x731   :  { %v2004_v42 = vmul.f32 -1.442695, %v2619_v29 }
 0x732   :  { %v2005_v47 = vmul.f32 -1.442695, %v2620_v38  ;;  %v2006_v54 = vmul.f32 -1.442695, %v2636_v50 }
 0x733   :  { %2777 = vpow2.f32 %v2004_v42 }
 0x734   :  { %2779 = vpow2.f32 %v2005_v47 }
 0x735   :  { %2781 = vpow2.f32 %v2006_v54 }
 0x736   :  { %2783 = vtanh.f32 %v2635_v58 }
 0x73d   :  { %v2778_v61 = vpop.eup %2777 }
 0x73e   :  { %v2780_v2 = vpop.eup %2779  ;;  %v1655_v5 = vadd.f32 1.0, %v2778_v61 }
 0x73f   :  { %v1661_v8 = vadd.f32 1.0, %v2780_v2  ;;  %v2782_v11 = vpop.eup %2781 }
 0x740   :  { %2785 = vrcp.f32 %v1655_v5  ;;  %v2784_v15 = vpop.eup %2783  ;;  %v1668_v33 = vadd.f32 1.0, %v2782_v11  ;;  %v2010_v5 = vld [vmem:[%s3460_s5] ss:$0 sm:$0xff] }
 0x741   :  { %2787 = vrcp.f32 %v1661_v8 }
 0x742   :  { %2789 = vrcp.f32 %v1668_v33 }
 0x74a   :  { %v2786_v19 = vpop.eup %2785 }
 0x74b   :  { %v2788_v24 = vpop.eup %2787  ;;  %v1672_v28 = vmul.f32 %v2786_v19, %v2784_v15 }
 0x74c   :  { %v1671_v39 = vmul.f32 %v2788_v24, %v3391_v57  ;;  %v2790_v46 = vpop.eup %2789 }
 0x74e   :  { %v3431_v43 = vadd.f32 %v1672_v28, %v1671_v39 }
 0x750   :  { %2791 = vtanh.f32 %v3431_v43 }
 0x75a   :  { %v2792_v52 = vpop.eup %2791 }
 0x75b   :  { %v1675_v56 = vmul.f32 %v2792_v52, %v2790_v46 }
 0x75d   :  { %1748 = vmatmul.mubr.f32.vlgmr.msra.gmra.mrb[14].mxu0 %v1675_v56  ;;  %1819 = vmatmul.mubr.f32.vlgmr.msra.gmra.mrb[14].mxu1 %v1675_v56 }
 0x75e   :  { %2585 = vmatpush3.bf16.msra.mxu0 %v2584_v4  ;;  %2060 = vmatprep.mubr.msk.f32.mxu0 %vm2889_vm1, %v2887_v0 }
 0x75f   :  { %2586 = vmatprep.subr.bf16.mxu0 %v2888_v6 }
 0x762   :  { %2588 = vmatpush3.bf16.msra.mxu0 %v2587_v18 }
 0x763   :  { %2589 = vmatprep.subr.bf16.mxu0 %v2888_v6 }
 0x766   :  { %2591 = vmatpush3.bf16.msra.mxu0 %v2590_v9 }
 0x767   :  { %2592 = vmatprep.subr.bf16.mxu0 %v2888_v6 }
 0x76a   :  { %2594 = vmatpush3.bf16.msra.mxu0 %v2593_v23 }
 0x76b   :  { %2595 = vmatprep.subr.bf16.mxu0 %v2888_v6 }
 0x76e   :  { %2597 = vmatpush3.bf16.msra.mxu0 %v2596_v30 }
 0x76f   :  { %2598 = vmatprep.subr.bf16.mxu0 %v2888_v6 }
 0x772   :  { %2600 = vmatpush3.bf16.msra.mxu0 %v2599_v36 }
 0x773   :  { %2601 = vmatprep.subr.bf16.mxu0 %v2888_v6 }
 0x776   :  { %2603 = vmatpush3.bf16.msra.mxu0 %v2602_v40 }
 0x777   :  { %2604 = vmatprep.subr.bf16.mxu0 %v2888_v6 }
 0x77a   :  { %2606 = vmatpush3.bf16.msra.mxu0 %v2605_v48 }
 0x830   :  { %v1749_v49 = vpop.f32.mrb[14].mxu0  ;;  %v1820_v51 = vpop.f32.mrb[14].mxu1 }
 0x831   :  { %v2621_v53 = vadd.f32 %v1749_v49, %v3169_v14  ;;  %v1751_v55 = vpop.f32.mrb[15].mxu0  ;;  %v1822_v57 = vpop.f32.mrb[15].mxu1  ;;  %v2637_v25 = vadd.f32 %v1820_v51, %v3178_v44 }
 0x832   :  { %v2622_v59 = vadd.f32 %v1751_v55, %v3171_v16  ;;  %v2638_v0 = vadd.f32 %v1822_v57, %v3175_v37 }
 0x833   :  { %v2007_v62 = vmul.f32 -1.442695, %v2621_v53 }
 0x834   :  { %v2008_v12 = vmul.f32 -1.442695, %v2622_v59  ;;  %v2009_v22 = vmul.f32 -1.442695, %v2638_v0 }
 0x835   :  { %2793 = vpow2.f32 %v2007_v62 }
 0x836   :  { %2795 = vpow2.f32 %v2008_v12 }
 0x837   :  { %2797 = vpow2.f32 %v2009_v22 }
 0x838   :  { %2799 = vtanh.f32 %v2637_v25 }
 0x83f   :  { %v2794_v29 = vpop.eup %2793 }
 0x840   :  { %v2796_v34 = vpop.eup %2795  ;;  %v1832_v35 = vadd.f32 1.0, %v2794_v29 }
 0x841   :  { %v1838_v38 = vadd.f32 1.0, %v2796_v34  ;;  %v2798_v14 = vpop.eup %2797 }
 0x842   :  { %2801 = vrcp.f32 %v1832_v35  ;;  %v2800_v42 = vpop.eup %2799  ;;  %v1845_v54 = vadd.f32 1.0, %v2798_v14 }
 0x843   :  { %2803 = vrcp.f32 %v1838_v38 }
 0x844   :  { %2805 = vrcp.f32 %v1845_v54 }
 0x84c   :  { %v2802_v16 = vpop.eup %2801 }
 0x84d   :  { %v2804_v47 = vpop.eup %2803  ;;  %v1849_v50 = vmul.f32 %v2802_v16, %v2800_v42 }
 0x84e   :  { %v1848_v58 = vmul.f32 %v2804_v47, %v3431_v43  ;;  %v2806_v44 = vpop.eup %2805 }
 0x850   :  { %v1850_v37 = vadd.f32 %v1849_v50, %v1848_v58 }
 0x852   :  { %2807 = vtanh.f32 %v1850_v37 }
 0x85c   :  { %v2808_v61 = vpop.eup %2807 }
 0x85d   :  { %v1852_v2 = vmul.f32 %v2808_v61, %v2806_v44 }
 0x85f   :  { %2061 = vmatmul.mubr.f32.vlgmr.msra.gmra.mrb[16].mxu0 %v1852_v2 }
 0x932   :  { %v1942_v8 = vpop.f32.mrb[16].mxu0 }
 0x933   :  { %v1943_v11 = vadd.f32 %v2010_v5, %v1942_v8  ;;  %v2062_v15 = vpop.f32.mrb[17].mxu0 }
 0x935   :  { %1946 = vst [vmem:[#allocation8] sm:$0xff] %v1943_v11 }
 0x936   :  { %2864 = shalt.err (!%p2861_p6)
}
 0x937   :  { %s2865_s11 = scalar_lea.hbm %s3461_s6, 128 }
 0x938   :  { %p2866_p7 = scmp.ne.s32.totalorder %s3461_s6, %s2865_s11  ;;  %p2869_p8 = scmp.lt.u32.totalorder %s2865_s11, %s3461_s6 }
 0x93a   :  { %p2871_p9 = pnand %p2869_p8, %p2866_p7 }
 0x93c   :  { %2874 = shalt.err (!%p2871_p9)
}
 0x93d   :  { %1956 = dma.vmem_to_hbm [thread:$0]  %s1954_s7, 128, %s3461_s6, [#allocation5]  }
 0x93e   :  { %2879 = dma.done.wait [#allocation5], 128  }
 0x93f   :  { %2880 = vsyncadd [#allocation5], 4294967168 }
 0x940   :  { %1960 = vsyncpa [#allocation4], 1 }
 0x941   :  { %1961 = vsyncpa [#allocation7], 1 }
 0x942   :  { %1962 = vsyncpa [#allocation5], 1 }

</bundles_post_ra>
